<compile_context>
chip_gen: v7x
topology: tpu7x:2x2x1
jax: 0.10.0
libtpu: 0.0.40
codegen_flags: <defaults>
</compile_context>

<pallas_src>
import functools

import jax
import jax.numpy as jnp
from jax.experimental import pallas as pl
from jax.experimental.pallas import tpu as pltpu

HIDDEN_LAYER_DIM = 512
INIT_NODE_FEATURES_DIM = 24
NUM_RELATIONS = 4


def _single_tensorcore_chip():
    """True for 1-TensorCore-per-device chips (v5e / v6e). Safe fallback: False."""
    try:
        kind = jax.devices()[0].device_kind.lower()
    except Exception:
        return False
    return any(tag in kind for tag in ("v5e", "v6e", "lite"))


# ---------------------------------------------------------------------------
# Pallas kernel: fused Graph_Model forward for one output-column tile.
# ---------------------------------------------------------------------------
def rgcn_model_kernel(
    msg1_ref,    # [N, (R+1)*F0]      bf16   [x | A_0 x | ... | A_3 x]
    aflat_ref,   # [R*N, N]           bf16   per-relation normalized adjacency, stacked
    p_ref,       # [G, N]             bf16   mean-pool matrix (rows sum to 1)
    wcat1_ref,   # [(R+1)*F0, H]      bf16   [root1; W1_0; ...; W1_3]
    b1_ref,      # [1, H]             f32
    wcat2_ref,   # [1, (R+1)*H, TN]   bf16   contiguous column tile of layer-2 weights
    b2_ref,      # [1, TN]            f32
    out_ref,     # [G, TN]            f32    pooled graph embeddings (column tile)
    ah_ref,      # scratch [N, (R+1)*H] bf16
    *,
    guard_layer1,
):
    n_nodes = msg1_ref.shape[0]
    hidden = wcat1_ref.shape[1]
    num_rel = ah_ref.shape[1] // hidden - 1

    def build_messages():
        # ---- RGCNConv layer 1: one fused matmul over K = (R+1)*F0 ----
        h = jnp.dot(msg1_ref[...], wcat1_ref[...],
                    preferred_element_type=jnp.float32)
        h = jnp.maximum(h + b1_ref[...], 0.0)                     # [N, H] f32 (ReLU)
        h_bf = h.astype(jnp.bfloat16)
        ah_ref[:, 0:hidden] = h_bf
        # ---- all relation aggregations as ONE bf16 dot: [R*N, N] @ [N, H] ----
        m_all = jnp.dot(aflat_ref[...], h_bf,
                        preferred_element_type=jnp.float32).astype(jnp.bfloat16)
        # aligned sublane-slice copies into the fused layer-2 message scratch
        for r in range(num_rel):
            ah_ref[:, (r + 1) * hidden:(r + 2) * hidden] = (
                m_all[r * n_nodes:(r + 1) * n_nodes, :])

    if guard_layer1:
        # Grid is a serial loop on one TensorCore ("arbitrary" semantics):
        # build layer-1 activations + messages once; ah_ref persists across steps.
        @pl.when(pl.program_id(0) == 0)
        def _():
            build_messages()
    else:
        build_messages()

    # ---- RGCNConv layer 2: single long-K (=(R+1)*H) streaming matmul per tile ----
    h2 = jnp.dot(ah_ref[...], wcat2_ref[0], preferred_element_type=jnp.float32)
    h2 = jnp.maximum(h2 + b2_ref[...], 0.0)                       # [N, TN] f32 (ReLU)

    # ---- global_mean_pool (bf16 single-pass dot; pool rows hold 1/count) ----
    out_ref[...] = jnp.dot(p_ref[...], h2.astype(jnp.bfloat16),
                           preferred_element_type=jnp.float32)


# ---------------------------------------------------------------------------
# Glue: dense adjacency / pooling matrices, fused weight slabs, pallas_call.
# ---------------------------------------------------------------------------
def build_adjacency(edge_index, edge_type, num_nodes, num_relations):
    """A[r, i, j] = 1/in_deg_r(i) if there is an edge j -> i of relation r."""
    src = edge_index[0]
    dst = edge_index[1]
    adj = jnp.zeros((num_relations, num_nodes, num_nodes), jnp.float32)
    adj = adj.at[edge_type, dst, src].add(1.0)
    deg = adj.sum(axis=2, keepdims=True)                 # per-relation in-degree
    adj = jnp.where(deg > 0, adj / jnp.maximum(deg, 1.0), 0.0)
    return adj


def build_pool_matrix(batch, num_graphs, num_nodes):
    onehot = (batch[None, :] == jnp.arange(num_graphs)[:, None]).astype(jnp.float32)
    counts = onehot.sum(axis=1, keepdims=True)
    return onehot / jnp.maximum(counts, 1.0)             # [G, N]


def graph_model_forward(x, edge_index, edge_type, batch, params, num_graphs,
                        tile_n=None, single_core=None):
    n_nodes, f0 = x.shape
    hidden = params["root2"].shape[1]
    num_rel = params["w1"].shape[0]

    if single_core is None:
        single_core = _single_tensorcore_chip()
    if tile_n is None:
        # v5e/v6e: 2 big tiles (layer-1 hoisted once). v7x: 4 tiles -> 2 per core.
        tile_n = 256 if single_core else 128
    assert hidden % tile_n == 0
    num_tiles = hidden // tile_n

    adj = build_adjacency(edge_index, edge_type, n_nodes, num_rel)   # [R, N, N] f32
    pool = build_pool_matrix(batch, num_graphs, n_nodes)             # [G, N]    f32

    # Fused layer-1 operand [x | A_0 x | ... | A_3 x]; the A_r @ x products are
    # tiny and computed here so the kernel's layer-1 K dim is one aligned slab.
    msg1 = jnp.concatenate([x] + [adj[r] @ x for r in range(num_rel)], axis=1)
    msg1 = msg1.astype(jnp.bfloat16)                                  # [N, (R+1)*F0]
    adj_flat = adj.reshape(num_rel * n_nodes, n_nodes).astype(jnp.bfloat16)
    pool_bf = pool.astype(jnp.bfloat16)

    wcat1 = jnp.concatenate([params["root1"][None], params["w1"]], axis=0)
    wcat1 = wcat1.reshape((num_rel + 1) * f0, hidden).astype(jnp.bfloat16)
    kdim1 = (num_rel + 1) * f0
    kdim2 = (num_rel + 1) * hidden

    # Pre-split layer-2 weights into contiguous column tiles: [T, kdim2, tile_n].
    wcat2 = jnp.concatenate([params["root2"][None], params["w2"]], axis=0)
    wcat2 = wcat2.reshape(kdim2, hidden)
    wcat2_tiled = wcat2.reshape(kdim2, num_tiles, tile_n).transpose(1, 0, 2)
    wcat2_tiled = wcat2_tiled.astype(jnp.bfloat16)

    kernel = functools.partial(rgcn_model_kernel, guard_layer1=single_core)
    semantics = ("arbitrary",) if single_core else ("parallel",)

    out = pl.pallas_call(
        kernel,
        out_shape=jax.ShapeDtypeStruct((num_graphs, hidden), jnp.float32),
        grid_spec=pltpu.PrefetchScalarGridSpec(
            num_scalar_prefetch=0,
            grid=(num_tiles,),
            in_specs=[
                pl.BlockSpec((n_nodes, kdim1), lambda j: (0, 0)),               # msg1
                pl.BlockSpec((num_rel * n_nodes, n_nodes), lambda j: (0, 0)),   # adj flat
                pl.BlockSpec((num_graphs, n_nodes), lambda j: (0, 0)),          # pool
                pl.BlockSpec((kdim1, hidden), lambda j: (0, 0)),                # wcat1
                pl.BlockSpec((1, hidden), lambda j: (0, 0)),                    # b1
                pl.BlockSpec((1, kdim2, tile_n), lambda j: (j, 0, 0)),          # wcat2 tile
                pl.BlockSpec((1, tile_n), lambda j: (0, j)),                    # b2 tile
            ],
            out_specs=pl.BlockSpec((num_graphs, tile_n), lambda j: (0, j)),
            scratch_shapes=[pltpu.VMEM((n_nodes, kdim2), jnp.bfloat16)],
        ),
        compiler_params=pltpu.CompilerParams(dimension_semantics=semantics),
    )(msg1, adj_flat, pool_bf, wcat1, params["b1"], wcat2_tiled, params["b2"])
    return out


# ---------------------------------------------------------------------------
# Pure-JAX reference with the same precision choices as the kernel.
# ---------------------------------------------------------------------------
def reference_forward(x, edge_index, edge_type, batch, params, num_graphs):
    n_nodes, f0 = x.shape
    num_rel = params["w1"].shape[0]
    hidden = params["root2"].shape[1]
    adj = build_adjacency(edge_index, edge_type, n_nodes, num_rel)
    pool = build_pool_matrix(batch, num_graphs, n_nodes)

    msg1 = jnp.concatenate([x] + [adj[r] @ x for r in range(num_rel)], axis=1)
    wcat1 = jnp.concatenate([params["root1"][None], params["w1"]], axis=0)
    wcat1 = wcat1.reshape((num_rel + 1) * f0, hidden)
    h = jnp.dot(msg1.astype(jnp.bfloat16), wcat1.astype(jnp.bfloat16),
                preferred_element_type=jnp.float32) + params["b1"]
    h = jnp.maximum(h, 0.0)
    h_bf = h.astype(jnp.bfloat16)

    adj_bf = adj.astype(jnp.bfloat16).reshape(num_rel * n_nodes, n_nodes)
    m_all = jnp.dot(adj_bf, h_bf,
                    preferred_element_type=jnp.float32).astype(jnp.bfloat16)
    ah = jnp.concatenate(
        [h_bf] + [m_all[r * n_nodes:(r + 1) * n_nodes] for r in range(num_rel)],
        axis=1)
    wcat2 = jnp.concatenate([params["root2"][None], params["w2"]], axis=0)
    wcat2 = wcat2.reshape((num_rel + 1) * hidden, hidden)
    h2 = jnp.dot(ah, wcat2.astype(jnp.bfloat16),
                 preferred_element_type=jnp.float32) + params["b2"]
    h2 = jnp.maximum(h2, 0.0)
    return jnp.dot(pool.astype(jnp.bfloat16), h2.astype(jnp.bfloat16),
                   preferred_element_type=jnp.float32)


# ---------------------------------------------------------------------------
# Deterministic parameter init (shapes from Graph_Model.__init__).
# ---------------------------------------------------------------------------
def init_params(key, f0=INIT_NODE_FEATURES_DIM, h=HIDDEN_LAYER_DIM, r=NUM_RELATIONS):
    ks = jax.random.split(key, 6)
    s1 = 1.0 / jnp.sqrt(f0)
    s2 = 1.0 / jnp.sqrt(h)
    return {
        "w1":    jax.random.normal(ks[0], (r, f0, h), jnp.float32) * s1,
        "root1": jax.random.normal(ks[1], (f0, h), jnp.float32) * s1,
        "b1":    jax.random.normal(ks[2], (1, h), jnp.float32) * 0.01,
        "w2":    jax.random.normal(ks[3], (r, h, h), jnp.float32) * s2,
        "root2": jax.random.normal(ks[4], (h, h), jnp.float32) * s2,
        "b2":    jax.random.normal(ks[5], (1, h), jnp.float32) * 0.01,
    }


if __name__ == "__main__":
    key = jax.random.PRNGKey(0)
    k_param, k_x, k_src, k_dst, k_et = jax.random.split(key, 5)

    # Small graph: 16 nodes (2 graphs of 8 nodes each), 40 edges, 4 relations.
    N_NODES = 16
    N_EDGES = 40
    N_GRAPHS = 2

    params = init_params(k_param)

    x = jax.random.normal(k_x, (N_NODES, INIT_NODE_FEATURES_DIM), jnp.float32)
    src = jax.random.randint(k_src, (N_EDGES,), 0, N_NODES, jnp.int32)
    dst = jax.random.randint(k_dst, (N_EDGES,), 0, N_NODES, jnp.int32)
    edge_index = jnp.stack([src, dst], axis=0)                       # [2, E]
    edge_type = jax.random.randint(k_et, (N_EDGES,), 0, NUM_RELATIONS, jnp.int32)
    batch = jnp.concatenate(
        [jnp.zeros(N_NODES // 2, jnp.int32), jnp.ones(N_NODES // 2, jnp.int32)]
    )                                                                # [N]

    out = graph_model_forward(x, edge_index, edge_type, batch, params, N_GRAPHS)
    out = jax.block_until_ready(out)

    ref = reference_forward(x, edge_index, edge_type, batch, params, N_GRAPHS)
    assert out.shape == (N_GRAPHS, HIDDEN_LAYER_DIM)
    assert jnp.allclose(out, ref, atol=2e-2, rtol=2e-2), "mismatch vs reference"

    print("KERNEL_OK")
</pallas_src>

<mosaic_0001>
module attributes {stable_mosaic.version = 11 : i64} {
  func.func @rgcn_model_kernel(%arg0: i32, %arg1: memref<16x120xbf16, #tpu.memory_space<vmem>>, %arg2: memref<64x16xbf16, #tpu.memory_space<vmem>>, %arg3: memref<2x16xbf16, #tpu.memory_space<vmem>>, %arg4: memref<120x512xbf16, #tpu.memory_space<vmem>>, %arg5: memref<1x512xf32, #tpu.memory_space<vmem>>, %arg6: memref<1x2560x128xbf16, #tpu.memory_space<vmem>>, %arg7: memref<1x128xf32, #tpu.memory_space<vmem>>, %arg8: memref<2x128xf32, #tpu.memory_space<vmem>>, %arg9: memref<16x2560xbf16, #tpu.memory_space<vmem>>) attributes {dimension_semantics = [#tpu.dimension_semantics<parallel>], iteration_bounds = array<i64: 4>, scalar_prefetch = 0 : i64, scratch_operands = 1 : i64, tpu.core_type = #tpu.core_type<tc>, window_params = [{pipeline_mode = #tpu.pipeline_mode<synchronous>, transform_indices = @transform_0, window_bounds = array<i64: 16, 120>}, {pipeline_mode = #tpu.pipeline_mode<synchronous>, transform_indices = @transform_1, window_bounds = array<i64: 64, 16>}, {pipeline_mode = #tpu.pipeline_mode<synchronous>, transform_indices = @transform_2, window_bounds = array<i64: 2, 16>}, {pipeline_mode = #tpu.pipeline_mode<synchronous>, transform_indices = @transform_3, window_bounds = array<i64: 120, 512>}, {pipeline_mode = #tpu.pipeline_mode<synchronous>, transform_indices = @transform_4, window_bounds = array<i64: 1, 512>}, {transform_indices = @transform_5, window_bounds = array<i64: 1, 2560, 128>}, {transform_indices = @transform_6, window_bounds = array<i64: 1, 128>}, {transform_indices = @transform_7, window_bounds = array<i64: 2, 128>}]} {
    %c0 = arith.constant 0 : index
    %c0_0 = arith.constant 0 : index
    %0 = vector.load %arg1[%c0, %c0_0] : memref<16x120xbf16, #tpu.memory_space<vmem>>, vector<16x120xbf16>
    %c0_1 = arith.constant 0 : index
    %c0_2 = arith.constant 0 : index
    %1 = vector.load %arg4[%c0_1, %c0_2] : memref<120x512xbf16, #tpu.memory_space<vmem>>, vector<120x512xbf16>
    %cst = arith.constant dense<0.000000e+00> : vector<16x512xf32>
    %2 = tpu.matmul %0, %1, %cst {dimension_numbers = #tpu.dot_dimension_numbers<[1], [0], [0], [1], [0, 0, 1, 1], [], []>} : vector<16x120xbf16>, vector<120x512xbf16>, vector<16x512xf32> -> vector<16x512xf32>
    %c0_3 = arith.constant 0 : index
    %c0_4 = arith.constant 0 : index
    %3 = vector.load %arg5[%c0_3, %c0_4] : memref<1x512xf32, #tpu.memory_space<vmem>>, vector<1x512xf32>
    %4 = vector.broadcast %3 : vector<1x512xf32> to vector<16x512xf32>
    %5 = arith.addf %2, %4 : vector<16x512xf32>
    %cst_5 = arith.constant 0.000000e+00 : f32
    %6 = vector.broadcast %cst_5 : f32 to vector<16x512xf32>
    %7 = arith.maximumf %5, %6 : vector<16x512xf32>
    %8 = arith.truncf %7 : vector<16x512xf32> to vector<16x512xbf16>
    %c0_6 = arith.constant 0 : index
    %c0_7 = arith.constant 0 : index
    %9 = vector.load %arg9[%c0_6, %c0_7] : memref<16x2560xbf16, #tpu.memory_space<vmem>>, vector<16x512xbf16>
    tpu.vector_store %arg9[%c0_6, %c0_7], %8 {strides = array<i32>} : memref<16x2560xbf16, #tpu.memory_space<vmem>>, vector<16x512xbf16>,
    %c0_8 = arith.constant 0 : index
    %c0_9 = arith.constant 0 : index
    %10 = vector.load %arg2[%c0_8, %c0_9] : memref<64x16xbf16, #tpu.memory_space<vmem>>, vector<64x16xbf16>
    %cst_10 = arith.constant dense<0.000000e+00> : vector<64x512xf32>
    %11 = tpu.matmul %10, %8, %cst_10 {dimension_numbers = #tpu.dot_dimension_numbers<[1], [0], [0], [1], [0, 0, 1, 1], [], []>} : vector<64x16xbf16>, vector<16x512xbf16>, vector<64x512xf32> -> vector<64x512xf32>
    %12 = arith.truncf %11 : vector<64x512xf32> to vector<64x512xbf16>
    %13 = vector.extract_strided_slice %12 {offsets = [0, 0], sizes = [16, 512], strides = [1, 1]} : vector<64x512xbf16> to vector<16x512xbf16>
    %c0_11 = arith.constant 0 : index
    %c512 = arith.constant 512 : index
    %14 = vector.load %arg9[%c0_11, %c512] : memref<16x2560xbf16, #tpu.memory_space<vmem>>, vector<16x512xbf16>
    tpu.vector_store %arg9[%c0_11, %c512], %13 {strides = array<i32>} : memref<16x2560xbf16, #tpu.memory_space<vmem>>, vector<16x512xbf16>,
    %15 = vector.extract_strided_slice %12 {offsets = [16, 0], sizes = [16, 512], strides = [1, 1]} : vector<64x512xbf16> to vector<16x512xbf16>
    %c0_12 = arith.constant 0 : index
    %c1024 = arith.constant 1024 : index
    %16 = vector.load %arg9[%c0_12, %c1024] : memref<16x2560xbf16, #tpu.memory_space<vmem>>, vector<16x512xbf16>
    tpu.vector_store %arg9[%c0_12, %c1024], %15 {strides = array<i32>} : memref<16x2560xbf16, #tpu.memory_space<vmem>>, vector<16x512xbf16>,
    %17 = vector.extract_strided_slice %12 {offsets = [32, 0], sizes = [16, 512], strides = [1, 1]} : vector<64x512xbf16> to vector<16x512xbf16>
    %c0_13 = arith.constant 0 : index
    %c1536 = arith.constant 1536 : index
    %18 = vector.load %arg9[%c0_13, %c1536] : memref<16x2560xbf16, #tpu.memory_space<vmem>>, vector<16x512xbf16>
    tpu.vector_store %arg9[%c0_13, %c1536], %17 {strides = array<i32>} : memref<16x2560xbf16, #tpu.memory_space<vmem>>, vector<16x512xbf16>,
    %19 = vector.extract_strided_slice %12 {offsets = [48, 0], sizes = [16, 512], strides = [1, 1]} : vector<64x512xbf16> to vector<16x512xbf16>
    %c0_14 = arith.constant 0 : index
    %c2048 = arith.constant 2048 : index
    %20 = vector.load %arg9[%c0_14, %c2048] : memref<16x2560xbf16, #tpu.memory_space<vmem>>, vector<16x512xbf16>
    tpu.vector_store %arg9[%c0_14, %c2048], %19 {strides = array<i32>} : memref<16x2560xbf16, #tpu.memory_space<vmem>>, vector<16x512xbf16>,
    %c0_15 = arith.constant 0 : index
    %c0_16 = arith.constant 0 : index
    %21 = vector.load %arg9[%c0_15, %c0_16] : memref<16x2560xbf16, #tpu.memory_space<vmem>>, vector<16x2560xbf16>
    %c0_17 = arith.constant 0 : index
    %c0_18 = arith.constant 0 : index
    %c0_19 = arith.constant 0 : index
    %22 = vector.load %arg6[%c0_17, %c0_18, %c0_19] : memref<1x2560x128xbf16, #tpu.memory_space<vmem>>, vector<1x2560x128xbf16>
    %23 = vector.shape_cast %22 : vector<1x2560x128xbf16> to vector<2560x128xbf16>
    %cst_20 = arith.constant dense<0.000000e+00> : vector<16x128xf32>
    %24 = tpu.matmul %21, %23, %cst_20 {dimension_numbers = #tpu.dot_dimension_numbers<[1], [0], [0], [1], [0, 0, 1, 1], [], []>} : vector<16x2560xbf16>, vector<2560x128xbf16>, vector<16x128xf32> -> vector<16x128xf32>
    %c0_21 = arith.constant 0 : index
    %c0_22 = arith.constant 0 : index
    %25 = vector.load %arg7[%c0_21, %c0_22] : memref<1x128xf32, #tpu.memory_space<vmem>>, vector<1x128xf32>
    %26 = vector.broadcast %25 : vector<1x128xf32> to vector<16x128xf32>
    %27 = arith.addf %24, %26 : vector<16x128xf32>
    %cst_23 = arith.constant 0.000000e+00 : f32
    %28 = vector.broadcast %cst_23 : f32 to vector<16x128xf32>
    %29 = arith.maximumf %27, %28 : vector<16x128xf32>
    %c0_24 = arith.constant 0 : index
    %c0_25 = arith.constant 0 : index
    %30 = vector.load %arg3[%c0_24, %c0_25] : memref<2x16xbf16, #tpu.memory_space<vmem>>, vector<2x16xbf16>
    %31 = arith.truncf %29 : vector<16x128xf32> to vector<16x128xbf16>
    %cst_26 = arith.constant dense<0.000000e+00> : vector<2x128xf32>
    %32 = tpu.matmul %30, %31, %cst_26 {dimension_numbers = #tpu.dot_dimension_numbers<[1], [0], [0], [1], [0, 0, 1, 1], [], []>} : vector<2x16xbf16>, vector<16x128xbf16>, vector<2x128xf32> -> vector<2x128xf32>
    %c0_27 = arith.constant 0 : index
    %c0_28 = arith.constant 0 : index
    %33 = vector.load %arg8[%c0_27, %c0_28] : memref<2x128xf32, #tpu.memory_space<vmem>>, vector<2x128xf32>
    tpu.vector_store %arg8[%c0_27, %c0_28], %32 {strides = array<i32>} : memref<2x128xf32, #tpu.memory_space<vmem>>, vector<2x128xf32>,
    return
  }
  func.func @transform_0(%arg0: i32) -> (i32, i32) {
    %c0_i32 = arith.constant 0 : i32
    %c0_i32_0 = arith.constant 0 : i32
    %c0_i32_1 = arith.constant 0 : i32
    return %c0_i32, %c0_i32_0 : i32, i32
  }
  func.func @transform_1(%arg0: i32) -> (i32, i32) {
    %c0_i32 = arith.constant 0 : i32
    %c0_i32_0 = arith.constant 0 : i32
    %c0_i32_1 = arith.constant 0 : i32
    return %c0_i32, %c0_i32_0 : i32, i32
  }
  func.func @transform_2(%arg0: i32) -> (i32, i32) {
    %c0_i32 = arith.constant 0 : i32
    %c0_i32_0 = arith.constant 0 : i32
    %c0_i32_1 = arith.constant 0 : i32
    return %c0_i32, %c0_i32_0 : i32, i32
  }
  func.func @transform_3(%arg0: i32) -> (i32, i32) {
    %c0_i32 = arith.constant 0 : i32
    %c0_i32_0 = arith.constant 0 : i32
    %c0_i32_1 = arith.constant 0 : i32
    return %c0_i32, %c0_i32_0 : i32, i32
  }
  func.func @transform_4(%arg0: i32) -> (i32, i32) {
    %c0_i32 = arith.constant 0 : i32
    %c0_i32_0 = arith.constant 0 : i32
    %c0_i32_1 = arith.constant 0 : i32
    return %c0_i32, %c0_i32_0 : i32, i32
  }
  func.func @transform_5(%arg0: i32) -> (i32, i32, i32) {
    %c0_i32 = arith.constant 0 : i32
    %c0_i32_0 = arith.constant 0 : i32
    %c0_i32_1 = arith.constant 0 : i32
    return %arg0, %c0_i32, %c0_i32_0 : i32, i32, i32
  }
  func.func @transform_6(%arg0: i32) -> (i32, i32) {
    %c0_i32 = arith.constant 0 : i32
    %c0_i32_0 = arith.constant 0 : i32
    return %c0_i32, %arg0 : i32, i32
  }
  func.func @transform_7(%arg0: i32) -> (i32, i32) {
    %c0_i32 = arith.constant 0 : i32
    %c0_i32_0 = arith.constant 0 : i32
    return %c0_i32, %arg0 : i32, i32
  }
}

</mosaic_0001>

<bundles_post_ra>
// kernel: tpu_custom_call.1
= control target key start
LH: loop header
LB: loop body
LE: loop exit
PB: predicated region body
PF: predicated region fallthrough
CT: control target
= control target key end

     0   :  { %s4528_s0 = inlined_call_operand.hbm [shape: bf16[16,120], index: 0, kind: input, shape index: {}]   ;;  %s4529_s1 = inlined_call_operand.vmem [shape: bf16[64,16], index: 1, kind: input, shape index: {}]   ;;  %s4530_s2 = inlined_call_operand.hbm [shape: bf16[2,16], index: 2, kind: input, shape index: {}]   ;;  %s4531_s3 = inlined_call_operand.hbm [shape: bf16[120,512], index: 3, kind: input, shape index: {}]   ;;  %s4532_s4 = inlined_call_operand.hbm [shape: f32[1,512], index: 4, kind: input, shape index: {}]   ;;  %s4533_s5 = inlined_call_operand.hbm [shape: bf16[4,2560,128], index: 5, kind: input, shape index: {}]   ;;  %s4534_s6 = inlined_call_operand.hbm [shape: f32[1,512], index: 6, kind: input, shape index: {}]   ;;  %s4535_s7 = inlined_call_operand.hbm [shape: f32[2,512], index: 7, kind: output, shape index: {}]  }
   0x1   :  { %4552 = sst [smem:[#allocation23_spill]] %s4528_s0 }
   0x2   :  { %4553 = sst [smem:[#allocation24_spill]] %s4530_s2 }
   0x3   :  { %4554 = sst [smem:[#allocation25_spill]] %s4533_s5 }
   0x4   :  { %12 = vsyncpa [#allocation4], 0 }
   0x5   :  { %13 = vsyncpa [#allocation7], 0 }
   0x6   :  { %14 = vsyncpa [#allocation10], 0 }
   0x7   :  { %15 = vsyncpa [#allocation5], 0 }
   0x8   :  { %17 = vsyncpa [#allocation5 + $0x1], 0  ;;  %s3909_s24 = smov 0   ;;  %s3911_s25 = smov 0  }
   0x9   :  { %s3913_s26 = smov 0   ;;  %s3915_s27 = smov 0  }
   0xa LB: > { %4555 = sst [smem:[#allocation19_spill]] %s3841_s24  ;;  %s3930_s28 = sadd.s32 4294967295, %s3853_s27   ;;  %s3853_s27 = sphi %s3915_s27, %s4589_s27   ;;  %s3849_s26 = sphi %s3913_s26, %s4593_s26   ;;  %s3845_s25 = sphi %s3911_s25, %s4592_s25   ;;  %s3841_s24 = sphi %s3909_s24, %s4591_s24  }
   0xb   : > { %s2832_s29 = sadd.s32 4294967294, %s3853_s27   ;;  %p148_p0 = scmp.ne.s32.totalorder %s3845_s25, %s3841_s24 }
   0xc   : > { %p4536_p1 = scmp.eq.s32.totalorder %s3930_s28, 0  ;;  %p204_p3 = scmp.eq.s32.totalorder %s2832_s29, 3 }
   0xd   : > { %p2833_p5 = scmp.ge.s32.totalorder %s3853_s27, 1  ;;  %p211_p7 = scmp.lt.s32.totalorder %s3853_s27, 5 }
   0xe   : > { %p3939_p4 = por %p4536_p1, %p148_p0  ;;  %p3944_p6 = por %p204_p3, %p148_p0 }
   0xf   : > { %p3949_p8 = pnand %p2833_p5, %p211_p7  ;;  %s3855_s10 = smov [#allocation3]  }
  0x10   : > { %s4556_s30 = scalar_select %p3939_p4, 1, 0 }
  0x11   : > { %s4557_s8 = scalar_select %p3944_p6, 1, 0 }
  0x12   : > { %s4559_s9 = scalar_select %p3949_p8, 1, 0 }
  0x13   : > { %4558 = sst [smem:[#allocation20_spill]] %s4557_s8  ;;  %s223_s11 = sshll.u32 %s3855_s10, 4  ;;  %s224_s11 = int_to_ptr.vmem [resolvable:$true] %s223_s11 }
  0x14   : > { %p3315_p9 = pneg %p3949_p8  ;;  %s3856_s13 = smov [#allocation6]  }
  0x15   : > { %s240_s14 = sshll.u32 %s3856_s13, 4  ;;  %s4561_s0 = sld [smem:[#allocation23_spill]]  ;;  %s3961_s14 = int_to_ptr.vmem [resolvable:$true] %s240_s14 }
  0x16   : > { %p3957_p10 = pnand %p3315_p9, %p4536_p1 }
  0x18   : > { %s4560_s12 = scalar_select %p3957_p10, 1, 0 }
  0x19   : > { %p3971_p12 = pneg %p3957_p10 }
  0x1b   : > { %s3603_s17 = scalar_lea.hbm %s4561_s0, 128 }
  0x1c   : > { %p3604_p11 = scmp.ne.s32.totalorder %s4561_s0, %s3603_s17  ;;  %p3610_p3 = scmp.lt.u32.totalorder %s3603_s17, %s4561_s0 }
  0x1e   : > { %p3606_p13 = pnand %p3971_p12, %p3604_p11 }
  0x20   : > { %p3607_p0 = pneg %p3606_p13 }
  0x22   : > { %p3612_p5 = pnand %p3610_p3, %p3607_p0 }
  0x24   : > { %3615 = shalt.err (!%p3612_p5)
}
  0x25   : > { %s3616_s23 = scalar_lea.vmem %s224_s11, 128  ;;  %p3624_p2 = scmp.lt.s32.totalorder %s224_s11, %s224_s11 }
  0x26   : > { %p3617_p7 = scmp.ne.s32.totalorder %s224_s11, %s3616_s23  ;;  %p3625_p6 = scmp.lt.s32.totalorder %s3616_s23, %s3616_s23 }
  0x28   : > { %p3619_p9 = pnand %p3617_p7, %p3971_p12  ;;  %p3626_p4 = por %p3625_p6, %p3624_p2 }
  0x2a   : > { %p3620_p1 = pneg %p3619_p9 }
  0x2c   : > { %p3627_p8 = pnand %p3626_p4, %p3620_p1 }
  0x2e   : > { %3630 = shalt.err (!%p3627_p8)
}
  0x2f   : > { %s4539_s29 = smov 64   ;;  %s4540_s10 = smov 4  }
  0x30   : > { %3318 = dma.hbm_to_vmem [thread:$0]  (!%p3957_p10), %s4561_s0, 128, %s224_s11, [#allocation4], %s4539_s29, %s4539_s29, %s4540_s10  }
  0x31   : > { %s4563_s2 = sld [smem:[#allocation24_spill]] }
  0x37   : > { %s3631_s18 = scalar_lea.hbm %s4563_s2, 16 }
  0x38   : > { %p3632_p1 = scmp.ne.s32.totalorder %s4563_s2, %s3631_s18  ;;  %p3638_p6 = scmp.lt.u32.totalorder %s3631_s18, %s4563_s2 }
  0x3a   : > { %p3634_p2 = pnand %p3632_p1, %p3971_p12 }
  0x3c   : > { %p3635_p4 = pneg %p3634_p2 }
  0x3e   : > { %p3640_p8 = pnand %p3638_p6, %p3635_p4 }
  0x40   : > { %3643 = shalt.err (!%p3640_p8)
}
  0x41   : > { %s3644_s11 = scalar_lea.vmem %s3961_s14, 16  ;;  %s3651_s13 = scalar_lea.vmem %s3961_s14, 32 }
  0x42   : > { %p3645_p11 = scmp.ne.s32.totalorder %s3961_s14, %s3644_s11  ;;  %p3652_p3 = scmp.lt.s32.totalorder %s3961_s14, %s3961_s14 }
  0x43   : > { %p3653_p5 = scmp.lt.s32.totalorder %s3651_s13, %s3644_s11 }
  0x44   : > { %p3647_p13 = pnand %p3645_p11, %p3971_p12 }
  0x45   : > { %p3654_p7 = por %p3653_p5, %p3652_p3 }
  0x46   : > { %p3648_p0 = pneg %p3647_p13 }
  0x48   : > { %p3655_p9 = pnand %p3654_p7, %p3648_p0 }
  0x4a   : > { %3658 = shalt.err (!%p3655_p9)
}
  0x4b   : > { %3321 = dma.hbm_to_vmem [thread:$0]  (!%p3957_p10), %s4563_s2, 16, %s3961_s14, [#allocation7]  }
  0x4c   : > { %s4015_s17 = sadd.s32 1, %s3853_s27   ;;  %s135_s18 = sadd.s32 1, %s3849_s26 }
  0x4d   : > { %4564 = sst [smem:[#allocation21_spill]] %s4015_s17  ;;  %s132_s19 = ssub.s32 %s3853_s27, %s4015_s17 }
  0x4e   : > { %p142_p1 = scmp.ne.s32.totalorder %s3849_s26, %s3845_s25  ;;  %p133_p2 = scmp.eq.s32.totalorder %s132_s19, 0 }
  0x4f   : > { %p143_p4 = scmp.eq.s32.totalorder %s3853_s27, 0  ;;  %p4565_p6 = scmp.eq.s32.totalorder %s3930_s28, 3 }
  0x50   : > { %p3343_p11 = scmp.lt.s32.totalorder %s3853_s27, 4  ;;  %s275_s23 = sand.u32 1, %s3853_s27  }
  0x51   : > { %p4025_p8 = por %p4565_p6, %p142_p1  ;;  %p144_p13 = por %p143_p4, %p142_p1 }
  0x52   : > { %s4031_s22 = scalar_select %p133_p2, %s3849_s26, %s135_s18  }
  0x53   : > { %s4566_s21 = scalar_select %p4025_p8, 1, 0 }
  0x54   : > { %4567 = sst [smem:[#allocation22_spill]] %s4031_s22  ;;  %s4541_s11 = sand.u32 1, %s3849_s26  }
  0x55   : > { %s3290_s14 = smul.u32 1280, %s4541_s11  ;;  %p4037_p0 = pnand %p3343_p11, %p144_p13 }
  0x56   : > { %s3291_s15 = smul.u32 20480, %s3853_s27  ;;  %s4569_s5 = sld [smem:[#allocation25_spill]] }
  0x57   : > { %s4568_s13 = scalar_select %p4037_p0, 1, 0 }
  0x58   : > { %s279_s18 = scalar_lea.vmem [#allocation11], %s3290_s14  ;;  %s3859_s11 = smov [#allocation8]  }
  0x59   : > { %s286_s10 = sshll.u32 %s279_s18, 4  ;;  %s4049_s0 = sshll.u32 %s3859_s11, 4  ;;  %s4047_s10 = int_to_ptr.vmem [resolvable:$true] %s286_s10  ;;  %s251_s0 = int_to_ptr.vmem [resolvable:$true] %s4049_s0 }
  0x5a   : > { %s4051_s2 = scalar_lea.sflag [#allocation4], %s275_s23  ;;  %p4547_p5 = pneg %p4037_p0 }
  0x5c   : > { %s4045_s29 = scalar_lea.hbm %s4569_s5, %s3291_s15  ;;  %s3664_s14 = scalar_lea.hbm %s4569_s5, 81920 }
  0x5d   : > { %s3659_s22 = scalar_lea.hbm %s4045_s29, 20480  ;;  %p3665_p1 = scmp.lt.u32.totalorder %s4045_s29, %s4569_s5 }
  0x5e   : > { %p3660_p3 = scmp.ne.s32.totalorder %s4045_s29, %s3659_s22  ;;  %p3666_p2 = scmp.lt.u32.totalorder %s3664_s14, %s3659_s22 }
  0x5f   : > { %p3668_p6 = scmp.lt.u32.totalorder %s3659_s22, %s4045_s29 }
  0x60   : > { %p3662_p7 = pnand %p4547_p5, %p3660_p3  ;;  %p3667_p4 = por %p3666_p2, %p3665_p1 }
  0x62   : > { %p3663_p9 = pneg %p3662_p7  ;;  %p3669_p11 = por %p3668_p6, %p3667_p4 }
  0x64   : > { %p3670_p13 = pnand %p3669_p11, %p3663_p9 }
  0x66   : > { %3673 = shalt.err (!%p3670_p13)
}
  0x67   : > { %s3674_s23 = scalar_lea.vmem %s4047_s10, 20480  ;;  %s3860_s11 = smov [#allocation11]  }
  0x68   : > { %p3675_p3 = scmp.ne.s32.totalorder %s4047_s10, %s3674_s23  ;;  %s3679_s15 = sshll.u32 %s3860_s11, 4  ;;  %s3680_s15 = int_to_ptr.vmem [resolvable:$false] %s3679_s15 }
  0x69   : > { %s3681_s16 = scalar_lea.vmem %s3680_s15, 40960  ;;  %p3682_p10 = scmp.lt.s32.totalorder %s4047_s10, %s3680_s15 }
  0x6a   : > { %p3677_p7 = pnand %p3675_p3, %p4547_p5  ;;  %p3683_p1 = scmp.lt.s32.totalorder %s3681_s16, %s3674_s23 }
  0x6c   : > { %p3678_p8 = pneg %p3677_p7  ;;  %p3684_p2 = por %p3683_p1, %p3682_p10 }
  0x6e   : > { %p3685_p4 = pnand %p3684_p2, %p3678_p8 }
  0x70   : > { %3688 = shalt.err (!%p3685_p4)
}
  0x71   : > { %s4570_s22 = smov 4   ;;  %s4571_s14 = smov 64  }
  0x72   : > { %3331 = dma.hbm_to_vmem [thread:$0]  (!%p4037_p0), %s4045_s29, 20480, %s4047_s10, %s4051_s2, %s4571_s14, %s4571_s14, %s4570_s22  }
  0x73   : > { %s3689_s11 = scalar_lea.hbm %s4531_s3, 3840 }
  0x74   : > { %p3690_p10 = scmp.ne.s32.totalorder %s4531_s3, %s3689_s11  ;;  %p3696_p6 = scmp.lt.u32.totalorder %s3689_s11, %s4531_s3 }
  0x76   : > { %p3692_p8 = pnand %p3690_p10, %p3971_p12 }
  0x78   : > { %p3693_p9 = pneg %p3692_p8 }
  0x7a   : > { %p3698_p11 = pnand %p3696_p6, %p3693_p9 }
  0x7c   : > { %3701 = shalt.err (!%p3698_p11)
}
  0x7d   : > { %s3702_s17 = scalar_lea.vmem %s251_s0, 3840  ;;  %p3710_p1 = scmp.lt.s32.totalorder %s251_s0, %s251_s0 }
  0x7e   : > { %p3703_p13 = scmp.ne.s32.totalorder %s251_s0, %s3702_s17  ;;  %p3711_p2 = scmp.lt.s32.totalorder %s3702_s17, %s3702_s17 }
  0x80   : > { %p3705_p3 = pnand %p3703_p13, %p3971_p12  ;;  %p3712_p4 = por %p3711_p2, %p3710_p1 }
  0x82   : > { %p3706_p7 = pneg %p3705_p3 }
  0x84   : > { %p3713_p5 = pnand %p3712_p4, %p3706_p7 }
  0x86   : > { %3716 = shalt.err (!%p3713_p5)
}
  0x87   : > { %s3861_s29 = smov 256   ;;  %s3862_s10 = smov 16  }
  0x88   : > { %p4572_p10 = scmp.ne.s32.totalorder %s4560_s12, 0  ;;  %s3863_s14 = smov [#allocation9]  }
  0x89   : > { %s264_s19 = sshll.u32 %s3863_s14, 4  ;;  %s2840_s18 = sshll.u32 %s3853_s27, 4  ;;  %s265_s19 = int_to_ptr.vmem [resolvable:$true] %s264_s19 }
  0x8a   : > { %3324 = dma.hbm_to_vmem [thread:$0]  (!%p4572_p10), %s4531_s3, 3840, %s251_s0, [#allocation7], %s3861_s29, %s3861_s29, %s3862_s10  }
  0x8b   : > { %s3717_s17 = scalar_lea.hbm %s4532_s4, 64 }
  0x8c   : > { %p3718_p5 = scmp.ne.s32.totalorder %s4532_s4, %s3717_s17  ;;  %p3724_p6 = scmp.lt.u32.totalorder %s3717_s17, %s4532_s4 }
  0x8e   : > { %p3720_p8 = pnand %p3718_p5, %p3971_p12 }
  0x90   : > { %p3721_p9 = pneg %p3720_p8 }
  0x92   : > { %p3726_p11 = pnand %p3724_p6, %p3721_p9 }
  0x94   : > { %3729 = shalt.err (!%p3726_p11)
}
  0x95   : > { %s3730_s0 = scalar_lea.vmem %s265_s19, 64  ;;  %p3738_p1 = scmp.lt.s32.totalorder %s265_s19, %s265_s19 }
  0x96   : > { %p3731_p13 = scmp.ne.s32.totalorder %s265_s19, %s3730_s0  ;;  %p3739_p2 = scmp.lt.s32.totalorder %s3730_s0, %s3730_s0 }
  0x98   : > { %p3733_p3 = pnand %p3731_p13, %p3971_p12  ;;  %p3740_p4 = por %p3739_p2, %p3738_p1 }
  0x9a   : > { %p3734_p7 = pneg %p3733_p3 }
  0x9c   : > { %p3741_p0 = pnand %p3740_p4, %p3734_p7 }
  0x9e   : > { %3744 = shalt.err (!%p3741_p0)
}
  0x9f   : > { %3327 = dma.hbm_to_vmem [thread:$0]  (!%p4572_p10), %s4532_s4, 64, %s265_s19, [#allocation10]  }
  0xa0   : > { %s4123_s5 = scalar_lea.hbm %s4534_s6, %s2840_s18  ;;  %s4573_s20 = sand.u32 1, %s3849_s26  }
  0xa1   : > { %s299_s22 = scalar_lea.vmem [#allocation12], %s4573_s20  ;;  %s3745_s12 = scalar_lea.hbm %s4123_s5, 16 }
  0xa2   : > { %s306_s14 = sshll.u32 %s299_s22, 4  ;;  %p3746_p12 = scmp.ne.s32.totalorder %s4123_s5, %s3745_s12  ;;  %s307_s14 = int_to_ptr.vmem [resolvable:$true] %s306_s14 }
  0xa3   : > { %p4574_p0 = scmp.ne.s32.totalorder %s4568_s13, 0  ;;  %s3750_s23 = scalar_lea.hbm %s4534_s6, 64 }
  0xa4   : > { %p3751_p10 = scmp.lt.u32.totalorder %s4123_s5, %s4534_s6  ;;  %p3752_p6 = scmp.lt.u32.totalorder %s3750_s23, %s3745_s12 }
  0xa5   : > { %p4575_p5 = pneg %p4574_p0  ;;  %p3754_p13 = scmp.lt.u32.totalorder %s3745_s12, %s4123_s5 }
  0xa6   : > { %p3753_p11 = por %p3752_p6, %p3751_p10 }
  0xa7   : > { %p3748_p8 = pnand %p3746_p12, %p4575_p5 }
  0xa8   : > { %p3755_p3 = por %p3754_p13, %p3753_p11 }
  0xa9   : > { %p3749_p9 = pneg %p3748_p8 }
  0xab   : > { %p3756_p7 = pnand %p3755_p3, %p3749_p9 }
  0xad   : > { %3759 = shalt.err (!%p3756_p7)
}
  0xae   : > { %s3760_s15 = scalar_lea.vmem %s307_s14, 16  ;;  %p4576_p2 = pmov %p4575_p5 }
  0xaf   : > { %p3761_p1 = scmp.ne.s32.totalorder %s307_s14, %s3760_s15  ;;  %s3864_s16 = smov [#allocation12]  }
  0xb0   : > { %s3765_s0 = sshll.u32 %s3864_s16, 4  ;;  %s3766_s0 = int_to_ptr.vmem [resolvable:$false] %s3765_s0 }
  0xb1   : > { %p3763_p4 = pnand %p3761_p1, %p4576_p2  ;;  %s3767_s29 = scalar_lea.vmem %s3766_s0, 32 }
  0xb2   : > { %p3768_p5 = scmp.lt.s32.totalorder %s307_s14, %s3766_s0  ;;  %p3769_p8 = scmp.lt.s32.totalorder %s3767_s29, %s3760_s15 }
  0xb3   : > { %p3764_p12 = pneg %p3763_p4 }
  0xb4   : > { %p3770_p6 = por %p3769_p8, %p3768_p5 }
  0xb6   : > { %p3771_p10 = pnand %p3770_p6, %p3764_p12 }
  0xb8   : > { %3774 = shalt.err (!%p3771_p10)
}
  0xb9   : > { %3334 = dma.hbm_to_vmem [thread:$0]  (!%p4574_p0), %s4123_s5, 16, %s307_s14, %s4051_s2  }
  0xba   : > { %p4577_p9 = scmp.ne.s32.totalorder %s4559_s9, 0 }
  0xbb   : > { %p4578_p11 = scmp.eq.s32.totalorder (!%p4577_p9), %s3930_s28, 0 }
  0xbc   : > { %315 = sbr.rel (%p4577_p9) target bundleno = 1235 (0x4d3), region = 48 }
  0xc3   : > { %3820 = dma.done.wait (%p4578_p11), [#allocation4], 128   ;;  %p4579_p13 = pmov %p4578_p11 }
  0xc4   : > { %p4580_p3 = pmov %p4578_p11 }
  0xc5   : > { %3822 = vsyncadd (%p4579_p13), [#allocation4], 4294967168 }
  0xc6   : > { %3824 = dma.done.wait (%p4580_p3), [#allocation7], 3856   ;;  %p4581_p7 = pmov %p4580_p3 }
  0xc7   : > { %p4582_p1 = pmov %p4580_p3 }
  0xc8   : > { %3826 = vsyncadd (%p4581_p7), [#allocation7], 4294963440 }
  0xc9   : > { %3828 = dma.done.wait (%p4582_p1), [#allocation10], 64   ;;  %p4583_p0 = pmov %p4582_p1 }
  0xca   : > { %s333_s2 = sand.u32 1, %s3930_s28   ;;  %s4163_s9 = sand.u32 1, %s3845_s25  }
  0xcb   : > { %3830 = vsyncadd (%p4583_p0), [#allocation10], 4294967232  ;;  %s3292_s13 = smul.u32 1280, %s4163_s9  ;;  %s334_s10 = scalar_lea.sflag [#allocation4], %s333_s2 }
  0xcc   : > { %p4584_p2 = scmp.ne.s32.totalorder %s4556_s30, 0 }
  0xcd   : > { %s4166_s24 = scalar_lea.vmem [#allocation11], %s3292_s13 }
  0xce   : > { %3832 = dma.done.wait (%p4584_p2), %s334_s10, 20496  }
  0xcf   : > { %3834 = vsyncadd (%p4584_p2), %s334_s10, 4294946800  ;;  %v3865_v0 = vmov 0   ;;  %v3392_v1 = vld [vmem:[#allocation8 + $0x4] ss:$16 sps:$4 sm:$0xff]   ;;  %v3394_v2 = vld [vmem:[#allocation8 + $0xc] ss:$16 sps:$4 sm:$0xff]   ;;  %v415_v38 = vlaneseq }
  0xd0   : > { %639 = vmatprep.mubr.bf16.mxu0 %v3865_v0  ;;  %682 = vmatprep.mubr.bf16.mxu1 %v3865_v0  ;;  %v3396_v3 = vld [vmem:[#allocation8] ss:$16 sps:$4 sm:$0xff]   ;;  %v3397_v4 = vld [vmem:[#allocation8 + $0x8] ss:$16 sps:$4 sm:$0xff]   ;;  %v3398_v5 = vld [vmem:[#allocation8 + $0x24] ss:$16 sps:$4 sm:$0xff]  }
  0xd1   : > { %607 = vmatprep.subr.bf16.mxu0 %v3392_v1  ;;  %650 = vmatprep.subr.bf16.mxu1 %v3394_v2  ;;  %v3400_v6 = vld [vmem:[#allocation8 + $0x2c] ss:$16 sps:$4 sm:$0xff]   ;;  %v3402_v7 = vld [vmem:[#allocation8 + $0x20] ss:$16 sps:$4 sm:$0xff]   ;;  %v3403_v8 = vld [vmem:[#allocation8 + $0x28] ss:$16 sps:$4 sm:$0xff]  }
  0xd2   : > { %608 = vmatpush1.bf16.msra.mxu0 %v3396_v3  ;;  %651 = vmatpush1.bf16.msra.mxu1 %v3397_v4  ;;  %v3404_v9 = vld [vmem:[#allocation8 + $0x44] ss:$16 sps:$4 sm:$0xff]   ;;  %v3406_v10 = vld [vmem:[#allocation8 + $0x4c] ss:$16 sps:$4 sm:$0xff]   ;;  %v3408_v11 = vld [vmem:[#allocation8 + $0x40] ss:$16 sps:$4 sm:$0xff]  }
  0xd3   : > { %609 = vmatprep.subr.bf16.mxu0 %v3398_v5  ;;  %652 = vmatprep.subr.bf16.mxu1 %v3400_v6  ;;  %v3409_v12 = vld [vmem:[#allocation8 + $0x48] ss:$16 sps:$4 sm:$0xff]   ;;  %v3410_v13 = vld [vmem:[#allocation8 + $0x64] ss:$16 sps:$4 sm:$0xff]   ;;  %v3412_v14 = vld [vmem:[#allocation8 + $0x6c] ss:$16 sps:$4 sm:$0xff]  }
  0xd4   : > { %v3414_v15 = vld [vmem:[#allocation8 + $0x60] ss:$16 sps:$4 sm:$0xff]   ;;  %v3415_v16 = vld [vmem:[#allocation8 + $0x68] ss:$16 sps:$4 sm:$0xff]   ;;  %v3416_v17 = vld [vmem:[#allocation8 + $0x84] ss:$16 sps:$4 sm:$0xff]  }
  0xd5   : > { %v3418_v18 = vld [vmem:[#allocation8 + $0x8c] ss:$16 sps:$4 sm:$0xff]   ;;  %v3420_v19 = vld [vmem:[#allocation8 + $0x80] ss:$16 sps:$4 sm:$0xff]   ;;  %v3421_v20 = vld [vmem:[#allocation8 + $0x88] ss:$16 sps:$4 sm:$0xff]  }
  0xd6   : > { %610 = vmatpush1.bf16.msra.mxu0 %v3402_v7  ;;  %653 = vmatpush1.bf16.msra.mxu1 %v3403_v8  ;;  %v3422_v21 = vld [vmem:[#allocation8 + $0xa4] ss:$16 sps:$4 sm:$0xff]   ;;  %v3424_v22 = vld [vmem:[#allocation8 + $0xac] ss:$16 sps:$4 sm:$0xff]   ;;  %v3426_v23 = vld [vmem:[#allocation8 + $0xa0] ss:$16 sps:$4 sm:$0xff]  }
  0xd7   : > { %611 = vmatprep.subr.bf16.mxu0 %v3404_v9  ;;  %654 = vmatprep.subr.bf16.mxu1 %v3406_v10  ;;  %v411_v24 = vld [vmem:[#allocation8 + $0xe0] sm:$0xff]  ;;  %vm594_vm0 = vcmask 1043456   ;;  %v412_v25 = vld [vmem:[#allocation8 + $0xe8] sm:$0xff]  ;;  %vm590_vm1 = vcmask 982016   ;;  %v3438_v37 = vld [vmem:[#allocation3] sm:$0xff]   ;;  %v416_v39 = vshrl.u32 %v415_v38, 7 }
  0xd8   : > { %v2876_v26 = vcombine.low %v411_v24, %v411_v24  ;;  %v3427_v27 = vld [vmem:[#allocation8 + $0xa8] ss:$16 sps:$4 sm:$0xff]   ;;  %v3428_v28 = vld [vmem:[#allocation8 + $0xc4] ss:$16 sps:$4 sm:$0xff]   ;;  %v2878_v29 = vcombine.low %v412_v25, %v412_v25  ;;  %v3430_v30 = vld [vmem:[#allocation8 + $0xcc] ss:$16 sps:$4 sm:$0xff]   ;;  %v2877_v35 = vcombine.high %v411_v24, %v411_v24  ;;  %v2879_v36 = vcombine.high %v412_v25, %v412_v25 }
  0xd9   : > { %v3432_v31 = vld [vmem:[#allocation8 + $0xc0] ss:$16 sps:$4 sm:$0xff]   ;;  %v3433_v32 = vld [vmem:[#allocation8 + $0xc8] ss:$16 sps:$4 sm:$0xff]   ;;  %v417_v40 = vsub.s32 0, %v416_v39  ;;  %v425_v41 = vsub.s32 2, %v416_v39 }
  0xda   : > { %612 = vmatpush1.bf16.msra.mxu0 %v3408_v11  ;;  %655 = vmatpush1.bf16.msra.mxu1 %v3409_v12  ;;  %v596_v33 = vsel %vm594_vm0, %v2876_v26, 0  ;;  %v602_v34 = vsel %vm594_vm0, %v2878_v29, 0  ;;  %v413_v42 = vld [vmem:[#allocation9] sm:$0xf]  ;;  %v421_v43 = vsub.s32 1, %v416_v39  ;;  %v429_v44 = vsub.s32 3, %v416_v39 }
  0xdb   : > { %613 = vmatprep.subr.bf16.mxu0 %v3410_v13  ;;  %656 = vmatprep.subr.bf16.mxu1 %v3412_v14  ;;  %v418_v45 = vrot.slane %v413_v42, %v417_v40  ;;  %v426_v46 = vrot.slane %v413_v42, %v425_v41  ;;  %v3440_v14 = vld [vmem:[%s4166_s24 + $0x40] sm:$0xff]   ;;  %vm737_vm2 = vcmask 130048   ;;  %v3450_v24 = vld [vmem:[%s4166_s24 + $0xd0] sm:$0xff]   ;;  %v3454_v29 = vld [vmem:[%s4166_s24 + $0xd8] sm:$0xff]   ;;  %s345_s11 = scalar_lea.vmem [#allocation12], %s4163_s9  ;;  %vm3867_vm3 = vmmov 0  }
  0xdc   : > { %v422_v47 = vrot.slane %v413_v42, %v421_v43  ;;  %v430_v48 = vrot.slane %v413_v42, %v429_v44  ;;  %v3448_v25 = vld [vmem:[%s4529_s1 + $0x8] sm:$0xff]   ;;  %v3466_v43 = vld [vmem:[%s4529_s1 + $0x18] sm:$0xff]   ;;  %s2846_s23 = sshll.u32 %s4163_s9, 1  ;;  %s3059_s15 = sshll.u32 %s3930_s28, 5 }
  0xdd   : > { %v3451_v26 = vld [vmem:[%s4166_s24 + $0x10] sm:$0xff]   ;;  %v3463_v38 = vld [vmem:[%s4166_s24 + $0xe8] sm:$0xff]   ;;  %s379_s18 = scalar_lea.vmem [#allocation13], %s2846_s23  ;;  %s4487_s29 = scalar_lea.hbm %s4535_s7, %s3059_s15 }
  0xde   : > { %614 = vmatpush1.bf16.msra.mxu0 %v3414_v15  ;;  %657 = vmatpush1.bf16.msra.mxu1 %v3415_v16  ;;  %v3441_v15 = vld [vmem:[%s4166_s24 + $0xc0] sm:$0xff]   ;;  %v3464_v39 = vld [vmem:[%s4166_s24 + $0x28] sm:$0xff]   ;;  %v3467_v41 = vld [vmem:[%s4166_s24 + $0x70] sm:$0xff]   ;;  %s2707_s17 = sshll.u32 %s379_s18, 4  ;;  %s2694_s2 = scalar_lea.sflag [#allocation5], %s4163_s9  ;;  %s4482_s17 = int_to_ptr.vmem [resolvable:$true] %s2707_s17 }
  0xdf   : > { %615 = vmatprep.subr.bf16.mxu0 %v3416_v17  ;;  %658 = vmatprep.subr.bf16.mxu1 %v3418_v18  ;;  %v3439_v16 = vld [vmem:[%s4529_s1] sm:$0xff]   ;;  %v3468_v42 = vld [vmem:[%s4166_s24 + $0xf0] sm:$0xff]   ;;  %s3775_s13 = scalar_lea.vmem %s4482_s17, 32  ;;  %p4585_p12 = scmp.ne.s32.totalorder %s4566_s21, 0 }
  0xe0   : > { %v3442_v17 = vld [vmem:[%s4166_s24] sm:$0xff]   ;;  %v3465_v40 = vld [vmem:[%s4166_s24 + $0xa8] sm:$0xff]   ;;  %v3469_v44 = vld [vmem:[%s4166_s24 + $0x30] sm:$0xff]   ;;  %p3776_p4 = scmp.ne.s32.totalorder %s4482_s17, %s3775_s13  ;;  %s3868_s28 = smov [#allocation13]  }
  0xe1   : > { %v3443_v18 = vld [vmem:[%s4166_s24 + $0x80] sm:$0xff]   ;;  %s3779_s10 = sshll.u32 %s3868_s28, 4  ;;  %s3780_s10 = int_to_ptr.vmem [resolvable:$false] %s3779_s10 }
  0xe2   : > { %616 = vmatpush1.bf16.msra.mxu0 %v3420_v19  ;;  %659 = vmatpush1.bf16.msra.mxu1 %v3421_v20  ;;  %v3444_v19 = vld [vmem:[%s4166_s24 + $0x48] sm:$0xff]   ;;  %p3777_p5 = pnand %p3776_p4, %p4585_p12  ;;  %p3782_p6 = scmp.lt.s32.totalorder %s4482_s17, %s3780_s10 }
  0xe3   : > { %617 = vmatprep.subr.bf16.mxu0 %v3422_v21  ;;  %660 = vmatprep.subr.bf16.mxu1 %v3424_v22  ;;  %v3445_v20 = vld [vmem:[%s4166_s24 + $0xc8] sm:$0xff]  }
  0xe4   : > { %v3446_v21 = vld [vmem:[%s4166_s24 + $0x8] sm:$0xff]   ;;  %p3778_p8 = pneg %p3777_p5 }
  0xe5   : > { %v3447_v22 = vld [vmem:[%s4166_s24 + $0x88] sm:$0xff]  }
  0xe6   : > { %618 = vmatpush1.bf16.msra.mxu0 %v3426_v23  ;;  %661 = vmatpush1.bf16.msra.mxu1 %v3427_v27  ;;  %v3449_v23 = vld [vmem:[%s4166_s24 + $0x50] sm:$0xff]  }
  0xe7   : > { %619 = vmatprep.subr.bf16.mxu0 %v3428_v28  ;;  %662 = vmatprep.subr.bf16.mxu1 %v3430_v30  ;;  %v3452_v27 = vld [vmem:[%s4166_s24 + $0x90] sm:$0xff]   ;;  %v3453_v28 = vld [vmem:[%s4166_s24 + $0x58] sm:$0xff]  }
  0xe8   : > { %v3455_v30 = vld [vmem:[%s4166_s24 + $0x18] sm:$0xff]  }
  0xea   : > { %620 = vmatpush1.bf16.msra.mxu0 %v3432_v31  ;;  %663 = vmatpush1.bf16.msra.mxu1 %v3433_v32  ;;  %v3456_v31 = vld [vmem:[%s4166_s24 + $0x98] sm:$0xff]   ;;  %v3458_v32 = vld [vmem:[%s4166_s24 + $0x60] sm:$0xff]  }
  0xeb   : > { %2880 = vmatprep.subr.msk.bf16.mxu0 %vm594_vm0, %v2877_v35  ;;  %2882 = vmatprep.subr.msk.bf16.mxu1 %vm594_vm0, %v2879_v36  ;;  %v3460_v35 = vld [vmem:[%s4166_s24 + $0x20] sm:$0xff]  }
  0xec   : > { %v3461_v36 = vld [vmem:[%s4166_s24 + $0xa0] sm:$0xff]  }
  0xee   : > { %622 = vmatpush1.bf16.msra.mxu0 %v596_v33  ;;  %665 = vmatpush1.bf16.msra.mxu1 %v602_v34  ;;  %v3459_v33 = vld [vmem:[%s4166_s24 + $0xe0] sm:$0xff]   ;;  %v3457_v34 = vld [vmem:[%s4529_s1 + $0x10] sm:$0xff]  }
  0xf1   : > { %2881 = vmatmul.mubr.msk.bf16.vlgmr.msra.gmra.mrb[0].mxu0 %vm590_vm1, %v3438_v37  ;;  %2883 = vmatmul.mubr.msk.bf16.vlgmr.msra.gmra.mrb[0].mxu1 %vm590_vm1, %v3438_v37  ;;  %v3462_v37 = vld [vmem:[%s4166_s24 + $0x68] sm:$0xff]  }
  0xf2   : > { %782 = vmatprep.mubr.bf16.mxu0 %v3865_v0  ;;  %855 = vmatprep.mubr.bf16.mxu1 %v3865_v0 }
 0x1c4   : > { %v641_v49 = vpop.f32.mrb[0].mxu0  ;;  %v684_v50 = vpop.f32.mrb[0].mxu1 }
 0x1c5   : > { %v642_v51 = vadd.f32 %v641_v49, %v418_v45  ;;  %v685_v52 = vadd.f32 %v684_v50, %v426_v46  ;;  %v643_v53 = vpop.f32.mrb[1].mxu0  ;;  %v686_v54 = vpop.f32.mrb[1].mxu1  ;;  %v3475_v49 = vld [vmem:[%s4166_s24 + $0x140] sm:$0xff]  }
 0x1c6   : > { %v644_v55 = vadd.f32 %v643_v53, %v422_v47  ;;  %v687_v56 = vadd.f32 %v686_v54, %v430_v48  ;;  %v645_v57 = vpop.f32.mrb[2].mxu0  ;;  %v688_v58 = vpop.f32.mrb[2].mxu1  ;;  %v3476_v50 = vld [vmem:[%s4166_s24 + $0x1c0] sm:$0xff]   ;;  %v3479_v53 = vld [vmem:[%s4166_s24 + $0x148] sm:$0xff]  }
 0x1c7   : > { %v695_v59 = vmax.f32 %v685_v52, 0.0  ;;  %v646_v60 = vadd.f32 %v645_v57, %v418_v45  ;;  %v689_v61 = vadd.f32 %v688_v58, %v426_v46  ;;  %v647_v62 = vpop.f32.mrb[3].mxu0  ;;  %v690_v63 = vpop.f32.mrb[3].mxu1  ;;  %v693_v4 = vmax.f32 %v642_v51, 0.0  ;;  %v3470_v45 = vld [vmem:[%s4166_s24 + $0xb0] sm:$0xff]   ;;  %v3471_v46 = vld [vmem:[%s4166_s24 + $0x78] sm:$0xff]  }
 0x1c8   : > { %v696_v1 = vmax.f32 %v687_v56, 0.0  ;;  %v648_v2 = vadd.f32 %v647_v62, %v422_v47  ;;  %v691_v3 = vadd.f32 %v690_v63, %v430_v48  ;;  %v694_v7 = vmax.f32 %v644_v55, 0.0  ;;  %v3472_v47 = vld [vmem:[%s4166_s24 + $0xf8] sm:$0xff]   ;;  %v3477_v51 = vld [vmem:[%s4166_s24 + $0x100] sm:$0xff]   ;;  %v3480_v54 = vld [vmem:[%s4166_s24 + $0x1c8] sm:$0xff]  }
 0x1c9   : > { %v697_v5 = vmax.f32 %v646_v60, 0.0  ;;  %v699_v6 = vmax.f32 %v689_v61, 0.0  ;;  %v3474_v48 = vld [vmem:[%s4166_s24 + $0xb8] sm:$0xff]   ;;  %v3478_v52 = vld [vmem:[%s4166_s24 + $0x180] sm:$0xff]   ;;  %v3481_v55 = vld [vmem:[%s4166_s24 + $0x108] sm:$0xff]  }
 0x1ca   : > { %v698_v8 = vmax.f32 %v648_v2, 0.0  ;;  %v700_v9 = vmax.f32 %v691_v3, 0.0  ;;  %v3482_v56 = vld [vmem:[%s4166_s24 + $0x188] sm:$0xff]   ;;  %v3483_v57 = vld [vmem:[%s4166_s24 + $0x150] sm:$0xff]   ;;  %v3487_v61 = vld [vmem:[%s4166_s24 + $0x158] sm:$0xff]  }
 0x1cb   : > { %v4180_v10 = vpack.c.bf16 %v697_v5, %v693_v4  ;;  %v4182_v11 = vpack.c.bf16 %v699_v6, %v695_v59  ;;  %v3484_v58 = vld [vmem:[%s4166_s24 + $0x1d0] sm:$0xff]   ;;  %v3488_v62 = vld [vmem:[%s4166_s24 + $0x1d8] sm:$0xff]   ;;  %v3491_v2 = vld [vmem:[%s4166_s24 + $0x160] sm:$0xff]  }
 0x1cc   : > { %v4184_v12 = vpack.c.bf16 %v698_v8, %v694_v7  ;;  %v4186_v13 = vpack.c.bf16 %v700_v9, %v696_v1  ;;  %v3485_v59 = vld [vmem:[%s4166_s24 + $0x110] sm:$0xff]   ;;  %v3489_v63 = vld [vmem:[%s4166_s24 + $0x118] sm:$0xff]   ;;  %v3492_v3 = vld [vmem:[%s4166_s24 + $0x1e0] sm:$0xff]  }
 0x1cd   : > { %v3486_v60 = vld [vmem:[%s4166_s24 + $0x190] sm:$0xff]   ;;  %v3490_v1 = vld [vmem:[%s4166_s24 + $0x198] sm:$0xff]   ;;  %v3493_v4 = vld [vmem:[%s4166_s24 + $0x120] sm:$0xff]  }
 0x1ce   : > { %750 = vmatprep.subr.bf16.mxu0 %v4184_v12  ;;  %823 = vmatprep.subr.bf16.mxu1 %v4186_v13  ;;  %v3494_v5 = vld [vmem:[%s4166_s24 + $0x1a0] sm:$0xff]   ;;  %v3495_v6 = vld [vmem:[%s4166_s24 + $0x168] sm:$0xff]  }
 0x1cf   : > { %751 = vmatpush1.bf16.msra.mxu0 %v4180_v10  ;;  %824 = vmatpush1.bf16.msra.mxu1 %v4182_v11  ;;  %v3496_v7 = vld [vmem:[%s4166_s24 + $0x1e8] sm:$0xff]  }
 0x1d0   : > { %3062 = vmatprep.subr.bf16.mxu0 %v3440_v14  ;;  %3084 = vmatprep.subr.bf16.mxu1 %v3441_v15  ;;  %v3497_v8 = vld [vmem:[%s4166_s24 + $0x128] sm:$0xff]   ;;  %v3503_v14 = vld [vmem:[%s4166_s24 + $0x178] sm:$0xff]  }
 0x1d1   : > { %v3498_v9 = vld [vmem:[%s4166_s24 + $0x1a8] sm:$0xff]   ;;  %v3504_v15 = vld [vmem:[%s4166_s24 + $0x1f8] sm:$0xff]  }
 0x1d2   : > { %2888 = vmatmul.mubr.msk.bf16.vlgmr.msra.gmra.mrb[4].mxu0 %vm737_vm2, %v3439_v16  ;;  %2892 = vmatmul.mubr.msk.bf16.vlgmr.msra.gmra.mrb[4].mxu1 %vm737_vm2, %v3439_v16  ;;  %v3505_v16 = vld [vmem:[%s4166_s24 + $0x138] sm:$0xff]  }
 0x1d3   : > { %3063 = vmatpush3.bf16.msra.mxu0 %v3442_v17  ;;  %3085 = vmatpush3.bf16.msra.mxu1 %v3443_v18  ;;  %v3506_v17 = vld [vmem:[%s4166_s24 + $0x1b8] sm:$0xff]   ;;  %v3507_v18 = vld [vmem:[%s4166_s24 + $0x240] sm:$0xff]  }
 0x1d4   : > { %3064 = vmatprep.subr.bf16.mxu0 %v3444_v19  ;;  %3086 = vmatprep.subr.bf16.mxu1 %v3445_v20  ;;  %v3508_v19 = vld [vmem:[%s4166_s24 + $0x2c0] sm:$0xff]  }
 0x1d5   : > { %792 = vmatprep.mubr.bf16.mxu0 %v3865_v0  ;;  %865 = vmatprep.mubr.bf16.mxu1 %v3865_v0 }
 0x1d7   : > { %3065 = vmatpush3.bf16.msra.mxu0 %v3446_v21  ;;  %3087 = vmatpush3.bf16.msra.mxu1 %v3447_v22 }
 0x1d8   : > { %3066 = vmatprep.subr.bf16.mxu0 %v3449_v23  ;;  %3088 = vmatprep.subr.bf16.mxu1 %v3450_v24 }
 0x1da   : > { %2889 = vmatmul.mubr.msk.bf16.gmra.mrb[8].mxu0 %vm737_vm2, %v3448_v25  ;;  %2893 = vmatmul.mubr.msk.bf16.gmra.mrb[8].mxu1 %vm737_vm2, %v3448_v25 }
 0x1db   : > { %3067 = vmatpush3.bf16.msra.mxu0 %v3451_v26  ;;  %3089 = vmatpush3.bf16.msra.mxu1 %v3452_v27 }
 0x1dc   : > { %3068 = vmatprep.subr.bf16.mxu0 %v3453_v28  ;;  %3090 = vmatprep.subr.bf16.mxu1 %v3454_v29 }
 0x1dd   : > { %802 = vmatprep.mubr.bf16.mxu0 %v3865_v0  ;;  %875 = vmatprep.mubr.bf16.mxu1 %v3865_v0 }
 0x1df   : > { %3069 = vmatpush3.bf16.msra.mxu0 %v3455_v30  ;;  %3091 = vmatpush3.bf16.msra.mxu1 %v3456_v31 }
 0x1e0   : > { %3070 = vmatprep.subr.bf16.mxu0 %v3458_v32  ;;  %3092 = vmatprep.subr.bf16.mxu1 %v3459_v33  ;;  %v3509_v32 = vld [vmem:[%s4166_s24 + $0x200] sm:$0xff]  }
 0x1e1   : > { %v3510_v33 = vld [vmem:[%s4166_s24 + $0x280] sm:$0xff]  }
 0x1e2   : > { %2890 = vmatmul.mubr.msk.bf16.gmra.mrb[12].mxu0 %vm737_vm2, %v3457_v34  ;;  %2894 = vmatmul.mubr.msk.bf16.gmra.mrb[12].mxu1 %vm737_vm2, %v3457_v34  ;;  %v3511_v34 = vld [vmem:[%s4166_s24 + $0x248] sm:$0xff]  }
 0x1e3   : > { %3071 = vmatpush3.bf16.msra.mxu0 %v3460_v35  ;;  %3093 = vmatpush3.bf16.msra.mxu1 %v3461_v36  ;;  %v3512_v35 = vld [vmem:[%s4166_s24 + $0x2c8] sm:$0xff]  }
 0x1e4   : > { %3072 = vmatprep.subr.bf16.mxu0 %v3462_v37  ;;  %3094 = vmatprep.subr.bf16.mxu1 %v3463_v38  ;;  %v3513_v36 = vld [vmem:[%s4166_s24 + $0x208] sm:$0xff]  }
 0x1e5   : > { %812 = vmatprep.mubr.bf16.mxu0 %v3865_v0  ;;  %885 = vmatprep.mubr.bf16.mxu1 %v3865_v0  ;;  %v3473_v0 = vld [vmem:[%s4166_s24 + $0x38] sm:$0xff]   ;;  %v3514_v37 = vld [vmem:[%s4166_s24 + $0x288] sm:$0xff]  }
 0x1e7   : > { %3073 = vmatpush3.bf16.msra.mxu0 %v3464_v39  ;;  %3095 = vmatpush3.bf16.msra.mxu1 %v3465_v40  ;;  %v3515_v40 = vld [vmem:[%s4166_s24 + $0x250] sm:$0xff]  }
 0x1e8   : > { %3074 = vmatprep.subr.bf16.mxu0 %v3467_v41  ;;  %3096 = vmatprep.subr.bf16.mxu1 %v3468_v42  ;;  %v3516_v41 = vld [vmem:[%s4166_s24 + $0x2d0] sm:$0xff]  }
 0x1ea   : > { %2891 = vmatmul.mubr.msk.bf16.gmra.mrb[16].mxu0 %vm737_vm2, %v3466_v43  ;;  %2895 = vmatmul.mubr.msk.bf16.gmra.mrb[16].mxu1 %vm737_vm2, %v3466_v43 }
 0x1eb   : > { %3075 = vmatpush3.bf16.msra.mxu0 %v3469_v44  ;;  %2267 = vmatprep.mubr.bf16.mxu0 %v4184_v12  ;;  %v3501_v12 = vld [vmem:[%s4166_s24 + $0x130] sm:$0xff]  }
 0x1ec   : > { %3097 = vmatpush3.bf16.msra.mxu1 %v3470_v45  ;;  %2308 = vmatprep.mubr.bf16.mxu1 %v4186_v13  ;;  %v3502_v13 = vld [vmem:[%s4166_s24 + $0x1b0] sm:$0xff]  }
 0x1ed   : > { %3076 = vmatprep.subr.bf16.mxu0 %v3471_v46  ;;  %3098 = vmatprep.subr.bf16.mxu1 %v3472_v47 }
 0x1ef   : > { %3077 = vmatpush3.bf16.msra.mxu0 %v3473_v0 }
 0x1f0   : > { %3099 = vmatpush3.bf16.msra.mxu1 %v3474_v48  ;;  %3106 = vmatprep.subr.bf16.mxu0 %v3475_v49  ;;  %v3517_v49 = vld [vmem:[%s4166_s24 + $0x210] sm:$0xff]  }
 0x1f1   : > { %3128 = vmatprep.subr.bf16.mxu1 %v3476_v50  ;;  %v3518_v50 = vld [vmem:[%s4166_s24 + $0x290] sm:$0xff]  }
 0x1f2   : > { %2268 = vmatmul.mubr.bf16.vlgmr.msra.gmra.mrb[20].mxu0 %v4180_v10  ;;  %v3499_v10 = vld [vmem:[%s4166_s24 + $0x170] sm:$0xff]  }
 0x1f3   : > { %2309 = vmatmul.mubr.bf16.vlgmr.msra.gmra.mrb[20].mxu1 %v4182_v11  ;;  %3107 = vmatpush3.bf16.msra.mxu0 %v3477_v51  ;;  %v3500_v11 = vld [vmem:[%s4166_s24 + $0x1f0] sm:$0xff]  }
 0x1f4   : > { %3129 = vmatpush3.bf16.msra.mxu1 %v3478_v52  ;;  %3108 = vmatprep.subr.bf16.mxu0 %v3479_v53  ;;  %v3519_v53 = vld [vmem:[%s4166_s24 + $0x258] sm:$0xff]  }
 0x1f5   : > { %3130 = vmatprep.subr.bf16.mxu1 %v3480_v54  ;;  %v3520_v54 = vld [vmem:[%s4166_s24 + $0x2d8] sm:$0xff]  }
 0x1f7   : > { %3109 = vmatpush3.bf16.msra.mxu0 %v3481_v55  ;;  %v3521_v55 = vld [vmem:[%s4166_s24 + $0x218] sm:$0xff]  }
 0x1f8   : > { %3131 = vmatpush3.bf16.msra.mxu1 %v3482_v56  ;;  %3110 = vmatprep.subr.bf16.mxu0 %v3483_v57  ;;  %v3522_v56 = vld [vmem:[%s4166_s24 + $0x298] sm:$0xff]  }
 0x1f9   : > { %3132 = vmatprep.subr.bf16.mxu1 %v3484_v58 }
 0x1fb   : > { %3111 = vmatpush3.bf16.msra.mxu0 %v3485_v59  ;;  %v3523_v59 = vld [vmem:[%s4166_s24 + $0x260] sm:$0xff]  }
 0x1fc   : > { %3133 = vmatpush3.bf16.msra.mxu1 %v3486_v60  ;;  %3112 = vmatprep.subr.bf16.mxu0 %v3487_v61  ;;  %v3524_v60 = vld [vmem:[%s4166_s24 + $0x2e0] sm:$0xff]  }
 0x1fd   : > { %3134 = vmatprep.subr.bf16.mxu1 %v3488_v62 }
 0x1ff   : > { %3113 = vmatpush3.bf16.msra.mxu0 %v3489_v63 }
 0x200   : > { %3135 = vmatpush3.bf16.msra.mxu1 %v3490_v1  ;;  %3114 = vmatprep.subr.bf16.mxu0 %v3491_v2 }
 0x201   : > { %3136 = vmatprep.subr.bf16.mxu1 %v3492_v3 }
 0x203   : > { %3115 = vmatpush3.bf16.msra.mxu0 %v3493_v4 }
 0x204   : > { %3137 = vmatpush3.bf16.msra.mxu1 %v3494_v5  ;;  %3116 = vmatprep.subr.bf16.mxu0 %v3495_v6  ;;  %v3525_v6 = vld [vmem:[%s4166_s24 + $0x220] sm:$0xff]  }
 0x205   : > { %3138 = vmatprep.subr.bf16.mxu1 %v3496_v7  ;;  %v3526_v7 = vld [vmem:[%s4166_s24 + $0x2a0] sm:$0xff]  }
 0x207   : > { %3117 = vmatpush3.bf16.msra.mxu0 %v3497_v8 }
 0x208   : > { %3139 = vmatpush3.bf16.msra.mxu1 %v3498_v9  ;;  %3118 = vmatprep.subr.bf16.mxu0 %v3499_v10  ;;  %v3527_v10 = vld [vmem:[%s4166_s24 + $0x268] sm:$0xff]  }
 0x209   : > { %3140 = vmatprep.subr.bf16.mxu1 %v3500_v11  ;;  %v3528_v11 = vld [vmem:[%s4166_s24 + $0x2e8] sm:$0xff]  }
 0x20b   : > { %3119 = vmatpush3.bf16.msra.mxu0 %v3501_v12  ;;  %v3529_v12 = vld [vmem:[%s4166_s24 + $0x228] sm:$0xff]  }
 0x20c   : > { %3141 = vmatpush3.bf16.msra.mxu1 %v3502_v13  ;;  %3120 = vmatprep.subr.bf16.mxu0 %v3503_v14  ;;  %v3530_v13 = vld [vmem:[%s4166_s24 + $0x2a8] sm:$0xff]  }
 0x20d   : > { %3142 = vmatprep.subr.bf16.mxu1 %v3504_v15 }
 0x20f   : > { %3121 = vmatpush3.bf16.msra.mxu0 %v3505_v16 }
 0x210   : > { %3143 = vmatpush3.bf16.msra.mxu1 %v3506_v17  ;;  %3150 = vmatprep.subr.bf16.mxu0 %v3507_v18  ;;  %v3531_v18 = vld [vmem:[%s4166_s24 + $0x270] sm:$0xff]  }
 0x211   : > { %3172 = vmatprep.subr.bf16.mxu1 %v3508_v19  ;;  %v3532_v19 = vld [vmem:[%s4166_s24 + $0x2f0] sm:$0xff]  }
 0x2a5   : > { %v784_v20 = vpop.f32.mrb[4].mxu0  ;;  %v857_v21 = vpop.f32.mrb[4].mxu1 }
 0x2a6   : > { %v786_v22 = vpop.f32.mrb[5].mxu0  ;;  %v859_v23 = vpop.f32.mrb[5].mxu1 }
 0x2a7   : > { %v788_v24 = vpop.f32.mrb[6].mxu0  ;;  %v861_v25 = vpop.f32.mrb[6].mxu1 }
 0x2a8   : > { %v896_v26 = vpack.c.bf16 %v788_v24, %v784_v20  ;;  %v898_v27 = vpack.c.bf16 %v861_v25, %v857_v21  ;;  %v790_v28 = vpop.f32.mrb[7].mxu0  ;;  %v863_v29 = vpop.f32.mrb[7].mxu1 }
 0x2a9   : > { %v897_v30 = vpack.c.bf16 %v790_v28, %v786_v22  ;;  %v899_v31 = vpack.c.bf16 %v863_v29, %v859_v23  ;;  %v3533_v28 = vld [vmem:[%s4166_s24 + $0x230] sm:$0xff]  }
 0x2aa   : > { %v3534_v29 = vld [vmem:[%s4166_s24 + $0x2b0] sm:$0xff]  }
 0x2ab   : > { %2349 = vmatprep.mubr.bf16.mxu0 %v897_v30  ;;  %2390 = vmatprep.mubr.bf16.mxu1 %v899_v31  ;;  %v3535_v30 = vld [vmem:[%s4166_s24 + $0x278] sm:$0xff]  }
 0x2ac   : > { %2350 = vmatmul.mubr.bf16.vlgmr.msra.gmra.mrb[24].mxu0 %v896_v26  ;;  %2391 = vmatmul.mubr.bf16.vlgmr.msra.gmra.mrb[24].mxu1 %v898_v27  ;;  %v3536_v31 = vld [vmem:[%s4166_s24 + $0x2f8] sm:$0xff]  }
 0x2ad   : > { %3151 = vmatpush3.bf16.msra.mxu0 %v3509_v32  ;;  %3173 = vmatpush3.bf16.msra.mxu1 %v3510_v33  ;;  %v4294_v38 = vpop.f32.mrb[8].mxu0  ;;  %v4296_v39 = vpop.f32.mrb[8].mxu1  ;;  %v3537_v33 = vld [vmem:[%s4166_s24 + $0x238] sm:$0xff]  }
 0x2ae   : > { %3152 = vmatprep.subr.bf16.mxu0 %v3511_v34  ;;  %3174 = vmatprep.subr.bf16.mxu1 %v3512_v35  ;;  %v796_v42 = vpop.f32.mrb[9].mxu0  ;;  %v869_v43 = vpop.f32.mrb[9].mxu1  ;;  %v3538_v34 = vld [vmem:[%s4166_s24 + $0x2b8] sm:$0xff]  }
 0x2af   : > { %v4300_v44 = vpop.f32.mrb[10].mxu0  ;;  %v4302_v45 = vpop.f32.mrb[10].mxu1 }
 0x2b0   : > { %v900_v46 = vpack.c.bf16 %v4300_v44, %v4294_v38  ;;  %v902_v47 = vpack.c.bf16 %v4302_v45, %v4296_v39  ;;  %v800_v0 = vpop.f32.mrb[11].mxu0  ;;  %v873_v48 = vpop.f32.mrb[11].mxu1  ;;  %v3547_v38 = vld [vmem:[%s4166_s24 + $0x350] sm:$0xff]  }
 0x2b1   : > { %3153 = vmatpush3.bf16.msra.mxu0 %v3513_v36  ;;  %3175 = vmatpush3.bf16.msra.mxu1 %v3514_v37  ;;  %v901_v51 = vpack.c.bf16 %v800_v0, %v796_v42  ;;  %v903_v52 = vpack.c.bf16 %v873_v48, %v869_v43  ;;  %v2896_v36 = vld [vmem:[%s345_s11] ss:$0 sm:$0xff]  ;;  %v3548_v44 = vld [vmem:[%s4166_s24 + $0x3d0] sm:$0xff]  }
 0x2b2   : > { %3154 = vmatprep.subr.bf16.mxu0 %v3515_v40  ;;  %3176 = vmatprep.subr.bf16.mxu1 %v3516_v41  ;;  %v3539_v40 = vld [vmem:[%s4166_s24 + $0x340] sm:$0xff]   ;;  %v3549_v39 = vld [vmem:[%s4166_s24 + $0x310] sm:$0xff]  }
 0x2b3   : > { %2431 = vmatprep.mubr.bf16.mxu0 %v901_v51  ;;  %2472 = vmatprep.mubr.bf16.mxu1 %v903_v52  ;;  %v3540_v41 = vld [vmem:[%s4166_s24 + $0x3c0] sm:$0xff]   ;;  %v3550_v45 = vld [vmem:[%s4166_s24 + $0x390] sm:$0xff]  }
 0x2b5   : > { %3155 = vmatpush3.bf16.msra.mxu0 %v3517_v49  ;;  %3177 = vmatpush3.bf16.msra.mxu1 %v3518_v50  ;;  %v4314_v57 = vpop.f32.mrb[12].mxu0  ;;  %v4316_v58 = vpop.f32.mrb[12].mxu1 }
 0x2b6   : > { %3156 = vmatprep.subr.bf16.mxu0 %v3519_v53  ;;  %3178 = vmatprep.subr.bf16.mxu1 %v3520_v54  ;;  %v4320_v61 = vpop.f32.mrb[13].mxu0  ;;  %v4322_v62 = vpop.f32.mrb[13].mxu1  ;;  %v3541_v54 = vld [vmem:[%s4166_s24 + $0x300] sm:$0xff]  }
 0x2b7   : > { %v4324_v63 = vpop.f32.mrb[14].mxu0  ;;  %v4326_v1 = vpop.f32.mrb[14].mxu1 }
 0x2b8   : > { %v904_v2 = vpack.c.bf16 %v4324_v63, %v4314_v57  ;;  %v906_v3 = vpack.c.bf16 %v4326_v1, %v4316_v58  ;;  %v4332_v4 = vpop.f32.mrb[15].mxu0  ;;  %v4334_v5 = vpop.f32.mrb[15].mxu1  ;;  %v3581_v57 = vld [vmem:[%s4166_s24 + $0x410] sm:$0xff]   ;;  %v3583_v63 = vld [vmem:[%s4166_s24 + $0x458] sm:$0xff]  }
 0x2b9   : > { %3157 = vmatpush3.bf16.msra.mxu0 %v3521_v55  ;;  %3179 = vmatpush3.bf16.msra.mxu1 %v3522_v56  ;;  %v905_v8 = vpack.c.bf16 %v4332_v4, %v4320_v61  ;;  %v907_v9 = vpack.c.bf16 %v4334_v5, %v4322_v62  ;;  %v3542_v55 = vld [vmem:[%s4166_s24 + $0x380] sm:$0xff]   ;;  %v3553_v61 = vld [vmem:[%s4166_s24 + $0x318] sm:$0xff]   ;;  %v3582_v58 = vld [vmem:[%s4166_s24 + $0x490] sm:$0xff]  }
 0x2ba   : > { %3158 = vmatprep.subr.bf16.mxu0 %v3523_v59  ;;  %3180 = vmatprep.subr.bf16.mxu1 %v3524_v60  ;;  %v3543_v59 = vld [vmem:[%s4166_s24 + $0x348] sm:$0xff]   ;;  %v3554_v62 = vld [vmem:[%s4166_s24 + $0x398] sm:$0xff]   ;;  %v3555_v4 = vld [vmem:[%s4166_s24 + $0x360] sm:$0xff]  }
 0x2bb   : > { %v3544_v60 = vld [vmem:[%s4166_s24 + $0x3c8] sm:$0xff]   ;;  %v3556_v5 = vld [vmem:[%s4166_s24 + $0x3e0] sm:$0xff]   ;;  %v3584_v1 = vld [vmem:[%s4166_s24 + $0x4d8] sm:$0xff]  }
 0x2bd   : > { %3159 = vmatpush3.bf16.msra.mxu0 %v3525_v6  ;;  %3181 = vmatpush3.bf16.msra.mxu1 %v3526_v7  ;;  %v4346_v14 = vpop.f32.mrb[16].mxu0  ;;  %v4348_v15 = vpop.f32.mrb[16].mxu1 }
 0x2be   : > { %3160 = vmatprep.subr.bf16.mxu0 %v3527_v10  ;;  %3182 = vmatprep.subr.bf16.mxu1 %v3528_v11  ;;  %v4350_v16 = vpop.f32.mrb[17].mxu0  ;;  %v4352_v17 = vpop.f32.mrb[17].mxu1  ;;  %v3545_v11 = vld [vmem:[%s4166_s24 + $0x308] sm:$0xff]  }
 0x2bf   : > { %v4356_v20 = vpop.f32.mrb[18].mxu0  ;;  %v4358_v21 = vpop.f32.mrb[18].mxu1 }
 0x2c0   : > { %v908_v22 = vpack.c.bf16 %v4356_v20, %v4346_v14  ;;  %v910_v23 = vpack.c.bf16 %v4358_v21, %v4348_v15  ;;  %v4364_v24 = vpop.f32.mrb[19].mxu0  ;;  %v4366_v25 = vpop.f32.mrb[19].mxu1 }
 0x2c1   : > { %3161 = vmatpush3.bf16.msra.mxu0 %v3529_v12  ;;  %3183 = vmatpush3.bf16.msra.mxu1 %v3530_v13  ;;  %v909_v26 = vpack.c.bf16 %v4364_v24, %v4350_v16  ;;  %v911_v27 = vpack.c.bf16 %v4366_v25, %v4352_v17  ;;  %v3546_v12 = vld [vmem:[%s4166_s24 + $0x388] sm:$0xff]   ;;  %v3587_v16 = vld [vmem:[%s4166_s24 + $0x460] sm:$0xff]  }
 0x2c2   : > { %3162 = vmatprep.subr.bf16.mxu0 %v3531_v18  ;;  %3184 = vmatprep.subr.bf16.mxu1 %v3532_v19  ;;  %v3559_v13 = vld [vmem:[%s4166_s24 + $0x368] sm:$0xff]   ;;  %v3588_v17 = vld [vmem:[%s4166_s24 + $0x4e0] sm:$0xff]  }
 0x2c3   : > { %v3560_v18 = vld [vmem:[%s4166_s24 + $0x3e8] sm:$0xff]   ;;  %v3589_v24 = vld [vmem:[%s4166_s24 + $0x420] sm:$0xff]  }
 0x2c4   : > { %v3561_v19 = vld [vmem:[%s4166_s24 + $0x328] sm:$0xff]   ;;  %v3590_v25 = vld [vmem:[%s4166_s24 + $0x4a0] sm:$0xff]  }
 0x2c5   : > { %3163 = vmatpush3.bf16.msra.mxu0 %v3533_v28  ;;  %3185 = vmatpush3.bf16.msra.mxu1 %v3534_v29  ;;  %v3078_v32 = vpop.f32.mrb[20].mxu0  ;;  %v3562_v28 = vld [vmem:[%s4166_s24 + $0x3a8] sm:$0xff]   ;;  %v3563_v29 = vld [vmem:[%s4166_s24 + $0x370] sm:$0xff]  }
 0x2c6   : > { %v3100_v35 = vpop.f32.mrb[20].mxu1  ;;  %v3079_v37 = vpop.f32.mrb[21].mxu0  ;;  %3164 = vmatprep.subr.bf16.mxu0 %v3535_v30  ;;  %3186 = vmatprep.subr.bf16.mxu1 %v3536_v31  ;;  %v3564_v30 = vld [vmem:[%s4166_s24 + $0x3f0] sm:$0xff]  }
 0x2c7   : > { %v3080_v42 = vadd.f32 %v3079_v37, %v3078_v32  ;;  %v3101_v43 = vpop.f32.mrb[21].mxu1  ;;  %v3081_v0 = vpop.f32.mrb[22].mxu0  ;;  %v3565_v31 = vld [vmem:[%s4166_s24 + $0x330] sm:$0xff]   ;;  %v3571_v37 = vld [vmem:[%s4166_s24 + $0x440] sm:$0xff]  }
 0x2c8   : > { %v3102_v48 = vadd.f32 %v3101_v43, %v3100_v35  ;;  %v3103_v49 = vpop.f32.mrb[22].mxu1  ;;  %v3082_v50 = vpop.f32.mrb[23].mxu0  ;;  %v3566_v32 = vld [vmem:[%s4166_s24 + $0x3b0] sm:$0xff]   ;;  %v3569_v35 = vld [vmem:[%s4166_s24 + $0x338] sm:$0xff]   ;;  %v3575_v43 = vld [vmem:[%s4166_s24 + $0x448] sm:$0xff]  }
 0x2c9   : > { %v2270_v51 = vadd.f32 %v3080_v42, %v2896_v36  ;;  %v3083_v52 = vadd.f32 %v3082_v50, %v3081_v0  ;;  %v3104_v53 = vpop.f32.mrb[23].mxu1  ;;  %3165 = vmatpush3.bf16.msra.mxu0 %v3537_v33  ;;  %3187 = vmatpush3.bf16.msra.mxu1 %v3538_v34  ;;  %v3567_v33 = vld [vmem:[%s4166_s24 + $0x378] sm:$0xff]   ;;  %v3574_v42 = vld [vmem:[%s4166_s24 + $0x480] sm:$0xff]   ;;  %v3576_v0 = vld [vmem:[%s4166_s24 + $0x4c8] sm:$0xff]  }
 0x2ca   : > { %v3105_v56 = vadd.f32 %v3104_v53, %v3103_v49  ;;  %3194 = vmatprep.subr.bf16.mxu0 %v3539_v40  ;;  %3216 = vmatprep.subr.bf16.mxu1 %v3540_v41  ;;  %v3568_v34 = vld [vmem:[%s4166_s24 + $0x3f8] sm:$0xff]   ;;  %v3572_v40 = vld [vmem:[%s4166_s24 + $0x4c0] sm:$0xff]   ;;  %v3578_v49 = vld [vmem:[%s4166_s24 + $0x488] sm:$0xff]  }
 0x2cb   : > { %v4385_v6 = vadd.f32 %v3102_v48, %v2270_v51  ;;  %v2273_v7 = vadd.f32 %v3083_v52, %v2896_v36  ;;  %v3570_v36 = vld [vmem:[%s4166_s24 + $0x3b8] sm:$0xff]   ;;  %v3573_v41 = vld [vmem:[%s4166_s24 + $0x400] sm:$0xff]   ;;  %v3577_v48 = vld [vmem:[%s4166_s24 + $0x408] sm:$0xff]  }
 0x2cc   : > { %2432 = vmatmul.mubr.bf16.vlgmr.msra.gmra.mrb[28].mxu0 %v900_v46  ;;  %2473 = vmatmul.mubr.bf16.vlgmr.msra.gmra.mrb[28].mxu1 %v902_v47  ;;  %v3551_v46 = vld [vmem:[%s4166_s24 + $0x358] sm:$0xff]   ;;  %v3579_v50 = vld [vmem:[%s4166_s24 + $0x450] sm:$0xff]   ;;  %v3593_v52 = vld [vmem:[%s4166_s24 + $0x428] sm:$0xff]  }
 0x2cd   : > { %v4393_v10 = vadd.f32 %v3105_v56, %v2273_v7  ;;  %3195 = vmatpush3.bf16.msra.mxu0 %v3541_v54  ;;  %3217 = vmatpush3.bf16.msra.mxu1 %v3542_v55  ;;  %v3552_v47 = vld [vmem:[%s4166_s24 + $0x3d8] sm:$0xff]   ;;  %v3580_v51 = vld [vmem:[%s4166_s24 + $0x4d0] sm:$0xff]   ;;  %v3594_v53 = vld [vmem:[%s4166_s24 + $0x4a8] sm:$0xff]  }
 0x2ce   : > { %3196 = vmatprep.subr.bf16.mxu0 %v3543_v59  ;;  %3218 = vmatprep.subr.bf16.mxu1 %v3544_v60  ;;  %v3595_v54 = vld [vmem:[%s4166_s24 + $0x470] sm:$0xff]   ;;  %v3599_v60 = vld [vmem:[%s4166_s24 + $0x478] sm:$0xff]  }
 0x2cf   : > { %2513 = vmatprep.mubr.bf16.mxu0 %v905_v8  ;;  %2554 = vmatprep.mubr.bf16.mxu1 %v907_v9  ;;  %v3557_v8 = vld [vmem:[%s4166_s24 + $0x320] sm:$0xff]   ;;  %v3596_v55 = vld [vmem:[%s4166_s24 + $0x4f0] sm:$0xff]   ;;  %v3600_v7 = vld [vmem:[%s4166_s24 + $0x4f8] sm:$0xff]  }
 0x2d0   : > { %v3558_v9 = vld [vmem:[%s4166_s24 + $0x3a0] sm:$0xff]   ;;  %v3597_v56 = vld [vmem:[%s4166_s24 + $0x430] sm:$0xff]  }
 0x2d1   : > { %3197 = vmatpush3.bf16.msra.mxu0 %v3545_v11  ;;  %3219 = vmatpush3.bf16.msra.mxu1 %v3546_v12  ;;  %v3598_v59 = vld [vmem:[%s4166_s24 + $0x4b0] sm:$0xff]   ;;  %v3601_v11 = vld [vmem:[%s4166_s24 + $0x438] sm:$0xff]  }
 0x2d2   : > { %3198 = vmatprep.subr.bf16.mxu0 %v3547_v38  ;;  %3220 = vmatprep.subr.bf16.mxu1 %v3548_v44  ;;  %v3602_v12 = vld [vmem:[%s4166_s24 + $0x4b8] sm:$0xff]   ;;  %v3866_v38 = vmov 0.0  }
 0x2d5   : > { %3199 = vmatpush3.bf16.msra.mxu0 %v3549_v39  ;;  %3221 = vmatpush3.bf16.msra.mxu1 %v3550_v45 }
 0x2d6   : > { %3200 = vmatprep.subr.bf16.mxu0 %v3551_v46  ;;  %3222 = vmatprep.subr.bf16.mxu1 %v3552_v47 }
 0x2d9   : > { %3201 = vmatpush3.bf16.msra.mxu0 %v3553_v61  ;;  %3223 = vmatpush3.bf16.msra.mxu1 %v3554_v62 }
 0x2da   : > { %3202 = vmatprep.subr.bf16.mxu0 %v3555_v4  ;;  %3224 = vmatprep.subr.bf16.mxu1 %v3556_v5 }
 0x2dd   : > { %3203 = vmatpush3.bf16.msra.mxu0 %v3557_v8  ;;  %3225 = vmatpush3.bf16.msra.mxu1 %v3558_v9 }
 0x2de   : > { %3204 = vmatprep.subr.bf16.mxu0 %v3559_v13  ;;  %3226 = vmatprep.subr.bf16.mxu1 %v3560_v18 }
 0x2e1   : > { %3205 = vmatpush3.bf16.msra.mxu0 %v3561_v19  ;;  %3227 = vmatpush3.bf16.msra.mxu1 %v3562_v28 }
 0x2e2   : > { %3206 = vmatprep.subr.bf16.mxu0 %v3563_v29  ;;  %3228 = vmatprep.subr.bf16.mxu1 %v3564_v30 }
 0x2e5   : > { %3207 = vmatpush3.bf16.msra.mxu0 %v3565_v31  ;;  %3229 = vmatpush3.bf16.msra.mxu1 %v3566_v32 }
 0x2e6   : > { %3208 = vmatprep.subr.bf16.mxu0 %v3567_v33  ;;  %3230 = vmatprep.subr.bf16.mxu1 %v3568_v34 }
 0x2e9   : > { %3209 = vmatpush3.bf16.msra.mxu0 %v3569_v35  ;;  %3231 = vmatpush3.bf16.msra.mxu1 %v3570_v36 }
 0x2ea   : > { %3238 = vmatprep.subr.bf16.mxu0 %v3571_v37  ;;  %3260 = vmatprep.subr.bf16.mxu1 %v3572_v40 }
 0x2ec   : > { %2514 = vmatmul.mubr.bf16.vlgmr.msra.gmra.mrb[32].mxu0 %v904_v2  ;;  %2555 = vmatmul.mubr.bf16.vlgmr.msra.gmra.mrb[32].mxu1 %v906_v3  ;;  %v3585_v2 = vld [vmem:[%s4166_s24 + $0x418] sm:$0xff]  }
 0x2ed   : > { %3239 = vmatpush3.bf16.msra.mxu0 %v3573_v41  ;;  %3261 = vmatpush3.bf16.msra.mxu1 %v3574_v42  ;;  %v3586_v3 = vld [vmem:[%s4166_s24 + $0x498] sm:$0xff]  }
 0x2ee   : > { %3240 = vmatprep.subr.bf16.mxu0 %v3575_v43  ;;  %3262 = vmatprep.subr.bf16.mxu1 %v3576_v0 }
 0x2ef   : > { %2595 = vmatprep.mubr.bf16.mxu0 %v909_v26  ;;  %2636 = vmatprep.mubr.bf16.mxu1 %v911_v27  ;;  %v3591_v26 = vld [vmem:[%s4166_s24 + $0x468] sm:$0xff]  }
 0x2f0   : > { %v3592_v27 = vld [vmem:[%s4166_s24 + $0x4e8] sm:$0xff]   ;;  %s3781_s24 = scalar_lea.vmem %s3780_s10, 64 }
 0x2f1   : > { %3241 = vmatpush3.bf16.msra.mxu0 %v3577_v48  ;;  %3263 = vmatpush3.bf16.msra.mxu1 %v3578_v49  ;;  %p3783_p10 = scmp.lt.s32.totalorder %s3781_s24, %s3775_s13 }
 0x2f2   : > { %3242 = vmatprep.subr.bf16.mxu0 %v3579_v50  ;;  %3264 = vmatprep.subr.bf16.mxu1 %v3580_v51 }
 0x2f3   : > { %p3784_p9 = por %p3783_p10, %p3782_p6 }
 0x2f5   : > { %3243 = vmatpush3.bf16.msra.mxu0 %v3581_v57  ;;  %3265 = vmatpush3.bf16.msra.mxu1 %v3582_v58  ;;  %p3785_p11 = pnand %p3784_p9, %p3778_p8 }
 0x2f6   : > { %3244 = vmatprep.subr.bf16.mxu0 %v3583_v63  ;;  %3266 = vmatprep.subr.bf16.mxu1 %v3584_v1 }
 0x2f9   : > { %3245 = vmatpush3.bf16.msra.mxu0 %v3585_v2  ;;  %3267 = vmatpush3.bf16.msra.mxu1 %v3586_v3 }
 0x2fa   : > { %3246 = vmatprep.subr.bf16.mxu0 %v3587_v16  ;;  %3268 = vmatprep.subr.bf16.mxu1 %v3588_v17 }
 0x2fd   : > { %3247 = vmatpush3.bf16.msra.mxu0 %v3589_v24  ;;  %3269 = vmatpush3.bf16.msra.mxu1 %v3590_v25 }
 0x2fe   : > { %3248 = vmatprep.subr.bf16.mxu0 %v3591_v26  ;;  %3270 = vmatprep.subr.bf16.mxu1 %v3592_v27 }
 0x301   : > { %3249 = vmatpush3.bf16.msra.mxu0 %v3593_v52  ;;  %3271 = vmatpush3.bf16.msra.mxu1 %v3594_v53 }
 0x302   : > { %3250 = vmatprep.subr.bf16.mxu0 %v3595_v54  ;;  %3272 = vmatprep.subr.bf16.mxu1 %v3596_v55 }
 0x305   : > { %3251 = vmatpush3.bf16.msra.mxu0 %v3597_v56  ;;  %3273 = vmatpush3.bf16.msra.mxu1 %v3598_v59 }
 0x306   : > { %3252 = vmatprep.subr.bf16.mxu0 %v3599_v60  ;;  %3274 = vmatprep.subr.bf16.mxu1 %v3600_v7 }
 0x309   : > { %3253 = vmatpush3.bf16.msra.mxu0 %v3601_v11  ;;  %3275 = vmatpush3.bf16.msra.mxu1 %v3602_v12 }
 0x30a   : > { %3284 = vmatprep.subr.bf16.mxu0 %v3866_v38 }
 0x30c   : > { %2596 = vmatmul.mubr.bf16.vlgmr.msra.gmra.mrb[36].mxu0 %v908_v22  ;;  %2637 = vmatmul.mubr.bf16.vlgmr.msra.gmra.mrb[36].mxu1 %v910_v23 }
 0x30d   : > { %3286 = vmatprep.mubr.msk.bf16.mxu0 %vm3867_vm3, %v3866_v38 }
 0x37f   : > { %v3122_v44 = vpop.f32.mrb[24].mxu0  ;;  %v3144_v39 = vpop.f32.mrb[24].mxu1 }
 0x380   : > { %v3123_v45 = vpop.f32.mrb[25].mxu0  ;;  %v3145_v46 = vpop.f32.mrb[25].mxu1 }
 0x381   : > { %v3124_v47 = vadd.f32 %v3123_v45, %v3122_v44  ;;  %v3146_v61 = vadd.f32 %v3145_v46, %v3144_v39  ;;  %v3125_v62 = vpop.f32.mrb[26].mxu0  ;;  %v3147_v4 = vpop.f32.mrb[26].mxu1  ;;  %v2647_v46 = vld [vmem:[#allocation6] sm:$0x1] }
 0x382   : > { %v3126_v5 = vpop.f32.mrb[27].mxu0  ;;  %v3148_v8 = vpop.f32.mrb[27].mxu1 }
 0x383   : > { %v2352_v14 = vadd.f32 %v3124_v47, %v4385_v6  ;;  %v3127_v20 = vadd.f32 %v3126_v5, %v3125_v62  ;;  %v3149_v22 = vadd.f32 %v3148_v8, %v3147_v4 }
 0x385   : > { %v2393_v15 = vadd.f32 %v3146_v61, %v2352_v14  ;;  %v2355_v21 = vadd.f32 %v3127_v20, %v4393_v10 }
 0x387   : > { %v2396_v23 = vadd.f32 %v3149_v22, %v2355_v21 }
 0x39f   : > { %v3166_v9 = vpop.f32.mrb[28].mxu0  ;;  %v3188_v13 = vpop.f32.mrb[28].mxu1 }
 0x3a0   : > { %v3167_v18 = vpop.f32.mrb[29].mxu0  ;;  %v3189_v19 = vpop.f32.mrb[29].mxu1 }
 0x3a1   : > { %v3168_v28 = vadd.f32 %v3167_v18, %v3166_v9  ;;  %v3190_v29 = vadd.f32 %v3189_v19, %v3188_v13  ;;  %v3169_v30 = vpop.f32.mrb[30].mxu0  ;;  %v3191_v31 = vpop.f32.mrb[30].mxu1 }
 0x3a2   : > { %v3170_v32 = vpop.f32.mrb[31].mxu0  ;;  %v3192_v33 = vpop.f32.mrb[31].mxu1 }
 0x3a3   : > { %v2434_v34 = vadd.f32 %v3168_v28, %v2393_v15  ;;  %v3171_v35 = vadd.f32 %v3170_v32, %v3169_v30  ;;  %v3193_v36 = vadd.f32 %v3192_v33, %v3191_v31 }
 0x3a5   : > { %v2475_v6 = vadd.f32 %v3190_v29, %v2434_v34  ;;  %v2437_v37 = vadd.f32 %v3171_v35, %v2396_v23 }
 0x3a7   : > { %v2478_v40 = vadd.f32 %v3193_v36, %v2437_v37 }
 0x3bf   : > { %v3210_v41 = vpop.f32.mrb[32].mxu0  ;;  %v3232_v42 = vpop.f32.mrb[32].mxu1 }
 0x3c0   : > { %v3211_v10 = vpop.f32.mrb[33].mxu0  ;;  %v3233_v43 = vpop.f32.mrb[33].mxu1 }
 0x3c1   : > { %v3212_v0 = vadd.f32 %v3211_v10, %v3210_v41  ;;  %v3234_v48 = vadd.f32 %v3233_v43, %v3232_v42  ;;  %v3213_v49 = vpop.f32.mrb[34].mxu0  ;;  %v3235_v50 = vpop.f32.mrb[34].mxu1 }
 0x3c2   : > { %v3214_v51 = vpop.f32.mrb[35].mxu0  ;;  %v3236_v57 = vpop.f32.mrb[35].mxu1 }
 0x3c3   : > { %v2516_v58 = vadd.f32 %v3212_v0, %v2475_v6  ;;  %v3215_v63 = vadd.f32 %v3214_v51, %v3213_v49  ;;  %v3237_v1 = vadd.f32 %v3236_v57, %v3235_v50 }
 0x3c5   : > { %v2557_v2 = vadd.f32 %v3234_v48, %v2516_v58  ;;  %v2519_v3 = vadd.f32 %v3215_v63, %v2478_v40 }
 0x3c7   : > { %v2560_v16 = vadd.f32 %v3237_v1, %v2519_v3 }
 0x3df   : > { %v3254_v17 = vpop.f32.mrb[36].mxu0  ;;  %v3276_v24 = vpop.f32.mrb[36].mxu1 }
 0x3e0   : > { %v3255_v25 = vpop.f32.mrb[37].mxu0  ;;  %v3277_v26 = vpop.f32.mrb[37].mxu1 }
 0x3e1   : > { %v3256_v27 = vadd.f32 %v3255_v25, %v3254_v17  ;;  %v3278_v52 = vadd.f32 %v3277_v26, %v3276_v24  ;;  %v3257_v53 = vpop.f32.mrb[38].mxu0  ;;  %v3279_v54 = vpop.f32.mrb[38].mxu1 }
 0x3e2   : > { %v3258_v55 = vpop.f32.mrb[39].mxu0  ;;  %v3280_v56 = vpop.f32.mrb[39].mxu1 }
 0x3e3   : > { %v2598_v59 = vadd.f32 %v3256_v27, %v2557_v2  ;;  %v3259_v60 = vadd.f32 %v3258_v55, %v3257_v53  ;;  %v3281_v7 = vadd.f32 %v3280_v56, %v3279_v54 }
 0x3e5   : > { %v2639_v11 = vadd.f32 %v3278_v52, %v2598_v59  ;;  %v2601_v12 = vadd.f32 %v3259_v60, %v2560_v16 }
 0x3e7   : > { %v2642_v38 = vadd.f32 %v3281_v7, %v2601_v12  ;;  %v2645_v44 = vmax.f32 %v2639_v11, 0.0 }
 0x3e9   : > { %v2646_v39 = vmax.f32 %v2642_v38, 0.0 }
 0x3eb   : > { %v2648_v45 = vpack.c.bf16 %v2646_v39, %v2645_v44 }
 0x3ed   : > { %3285 = vmatpush3.bf16.msra.mxu0 %v2648_v45 }
 0x3f0   : > { %3287 = vmatmul.mubr.msk.bf16.vlgmr.msra.gmra.mrb[40].mxu0 %vm737_vm2, %v2647_v46 }
 0x4c3   : > { %v2686_v47 = vpop.f32.mrb[40].mxu0 }
 0x4c4   : > { %2692 = vst [vmem:[%s379_s18] sm:$0x3] %v2686_v47  ;;  %v3288_v61 = vpop.f32.mrb[41].mxu0 }
 0x4c5   : > { %v2689_v62 = vpop.f32.mrb[42].mxu0 }
 0x4c6   : > { %3788 = shalt.err (!%p3785_p11)
}
 0x4c7   : > { %s3789_s9 = scalar_lea.hbm %s4487_s29, 32  ;;  %s3793_s5 = scalar_lea.hbm %s4535_s7, 128 }
 0x4c8   : > { %p3790_p13 = scmp.ne.s32.totalorder %s4487_s29, %s3789_s9  ;;  %p3794_p1 = scmp.lt.u32.totalorder %s4487_s29, %s4535_s7 }
 0x4c9   : > { %p3795_p0 = scmp.lt.u32.totalorder %s3793_s5, %s3789_s9  ;;  %p3797_p4 = scmp.lt.u32.totalorder %s3789_s9, %s4487_s29 }
 0x4ca   : > { %p3791_p3 = pnand %p3790_p13, %p4585_p12 }
 0x4cb   : > { %p3796_p2 = por %p3795_p0, %p3794_p1 }
 0x4cc   : > { %p3792_p7 = pneg %p3791_p3 }
 0x4cd   : > { %p3798_p5 = por %p3797_p4, %p3796_p2 }
 0x4cf   : > { %p3799_p8 = pnand %p3798_p5, %p3792_p7 }
 0x4d1   : > { %3802 = shalt.err (!%p3799_p8)
}
 0x4d2   : > { %3313 = dma.vmem_to_hbm [thread:$0]  (%p4585_p12), %s4482_s17, 32, %s4487_s29, %s2694_s2   ;;  %v3289_v4 = vpop.f32.mrb[43].mxu0 }
 0x4d3 PF: > { %s4586_s14 = sld [smem:[#allocation19_spill]]  ;;  %s4587_s12 = sld [smem:[#allocation20_spill]] }
 0x4d4   : > { %p3348_p6 = scmp.ge.s32.totalorder %s3853_s27, 2 }
 0x4d9   : > { %s2719_s19 = sand.u32 1, %s4586_s14   ;;  %p4588_p10 = scmp.ne.s32.totalorder %s4587_s12, 0 }
 0x4da   : > { %s2720_s11 = scalar_lea.sflag [#allocation5], %s2719_s19 }
 0x4db   : > { %p3336_p9 = pnand %p3348_p6, %p4588_p10 }
 0x4dd   : > { %3836 = dma.done.wait (!%p3336_p9), %s2720_s11, 32  }
 0x4de   : > { %3838 = vsyncadd (!%p3336_p9), %s2720_s11, 4294967264  ;;  %s4589_s27 = sld [smem:[#allocation21_spill]]  ;;  %s4590_s23 = sld [smem:[#allocation22_spill]] }
 0x4df   : > { %s4591_s24 = smov %s3845_s25  ;;  %s4592_s25 = smov %s3849_s26 }
 0x4e4   : > { %p20_p11 = scmp.ge.s32.totalorder %s4589_s27, 6   ;;  %s4593_s26 = smov %s4590_s23 }
 0x4e6   :  { %22 = sbr.rel (!%p20_p11) target bundleno = 10 (0xa), region = 119 }
 0x4ed   :  { %2725 = vsyncpa [#allocation4], 1 }
 0x4ee   :  { %2727 = vsyncpa [#allocation4 + $0x1], 1 }
 0x4ef   :  { %2728 = vsyncpa [#allocation7], 1 }
 0x4f0   :  { %2729 = vsyncpa [#allocation10], 1 }
 0x4f1   :  { %2730 = vsyncpa [#allocation5], 1 }
 0x4f2   :  { %2732 = vsyncpa [#allocation5 + $0x1], 1 }

</bundles_post_ra>
